<compile_context>
chip_gen: v7x
topology: tpu7x:2x2x1
jax: 0.10.0
libtpu: 0.0.40
codegen_flags: <defaults>
</compile_context>

<pallas_src>
import math

import jax
import jax.numpy as jnp
from jax import lax
from jax.experimental import pallas as pl
from jax.experimental.pallas import tpu as pltpu

# ----------------------------- config (small) -------------------------------
VOCAB = 50          # config.vocab_size
D_MODEL = 32        # config.d_model
PAD_ID = 1          # config.pad_token_id
MAX_POS = 32        # config.max_position_embeddings
HEADS = 4           # config.heads
D_FF = 64           # config.d_ff
NUM_LAYERS = 2      # config.num_layers
NUM_LABELS = 3      # config.num_labels
B = 2               # batch
S = 8               # seq len
DH = D_MODEL // HEADS
NEG_INF = -1e18
LANE = 128          # lane-dense packing width

# ---- packed "vecs" slab row offsets (one (VEC_ROWS, 128) f32 input) ----
EMB_G_R = 0
EMB_B_R = 1
LAYER_R0 = 2                       # 8 rows per layer: bq, bk, bvo, bo, ln_g, ln_b, b1, b2
ROWS_PER_LAYER = 8
HEAD_B_R = LAYER_R0 + NUM_LAYERS * ROWS_PER_LAYER   # 18: fused head bias
HEAD_W_R = 24                                        # 24..55: fused head weight (D rows)
VEC_ROWS = HEAD_W_R + D_MODEL                        # 56

# ---- packed per-layer weight slab (NUM_LAYERS, 128, 128) row offsets ----
WVO_R = 0                          # rows  0:32  -> Wvo (D, H*D) = (32, 128)
QKW_R = D_MODEL                    # rows 32:64  -> [Wq | Wk | W1] on lanes (32+32+64=128)
W2_R = 2 * D_MODEL                 # rows 64:128 -> W2 (D_FF, D) in cols 0:32
WL_ROWS = 2 * D_MODEL + D_FF       # 128
WL_COLS = LANE                     # 128 (H * D_MODEL == 128 exactly)


# ------------------------------ fused kernel ---------------------------------
def _fused_forward_kernel(x_ref, bias_ref, vec_ref, w_ref, o_ref):
    """Whole ClassificationHead forward, VMEM-resident, single invocation.

    x_ref    : (B*S, D)        word + position embedding sum
    bias_ref : (B*S, B*S)      additive attention bias (0 allowed / -1e18 masked;
                               encodes both key padding and the batch block-diagonal)
    vec_ref  : (VEC_ROWS, 128) all 1-D params + fused head weight/bias, packed
    w_ref    : (L, 128, 128)   per-layer weight slab [Wvo | Wq|Wk|W1 | W2]
    o_ref    : (B*S, 128)      fused dense+out_proj logits for every position
                               (cols >= NUM_LABELS are 0); sliced outside
    """
    D = D_MODEL

    # ---- embedding LayerNorm (eps = 1e-5) on the whole (B*S, D) slab ----
    x = x_ref[...]
    eg = vec_ref[EMB_G_R:EMB_G_R + 1, :D]
    eb = vec_ref[EMB_B_R:EMB_B_R + 1, :D]
    mu = jnp.mean(x, axis=-1, keepdims=True)
    var = jnp.mean((x - mu) ** 2, axis=-1, keepdims=True)
    x = (x - mu) * lax.rsqrt(var + 1e-5) * eg + eb

    bias = bias_ref[...]                           # loaded once, reused by both layers

    for li in range(NUM_LAYERS):                   # static unroll (2 layers)
        r0 = LAYER_R0 + li * ROWS_PER_LAYER
        bo = vec_ref[r0 + 3:r0 + 4, :D]
        ln_g = vec_ref[r0 + 4:r0 + 5, :D]
        ln_b = vec_ref[r0 + 5:r0 + 6, :D]
        b1 = vec_ref[r0 + 6:r0 + 7, :D_FF]
        b2 = vec_ref[r0 + 7:r0 + 8, :D]

        # ---- multi-head self-attention; W_o folded per head into the value proj ----
        attn_out = jnp.zeros((B * S, D), jnp.float32)
        for h in range(HEADS):                     # static unroll; 2-D matmuls only
            wq_h = w_ref[li, QKW_R:QKW_R + D, h * DH:(h + 1) * DH]            # (D, DH)
            wk_h = w_ref[li, QKW_R:QKW_R + D, D + h * DH:D + (h + 1) * DH]    # (D, DH)
            wvo_h = w_ref[li, WVO_R:WVO_R + D, h * D:(h + 1) * D]             # (D, D)
            bq_h = vec_ref[r0 + 0:r0 + 1, h * DH:(h + 1) * DH]
            bk_h = vec_ref[r0 + 1:r0 + 2, h * DH:(h + 1) * DH]
            bvo_h = vec_ref[r0 + 2:r0 + 3, h * D:(h + 1) * D]

            q = jnp.dot(x, wq_h, preferred_element_type=jnp.float32) + bq_h  # 1/sqrt(dh) folded
            k = jnp.dot(x, wk_h, preferred_element_type=jnp.float32) + bk_h
            v = jnp.dot(x, wvo_h, preferred_element_type=jnp.float32) + bvo_h

            # scores over the flattened (batch*seq) key axis; the additive bias
            # zeroes both cross-batch and padded keys (same as masked_fill(-1e18)).
            s = lax.dot_general(q, k, (((1,), (1,)), ((), ())),
                                preferred_element_type=jnp.float32) + bias    # (B*S, B*S)
            m = jnp.max(s, axis=-1, keepdims=True)
            e = jnp.exp(s - m)
            p = e / jnp.sum(e, axis=-1, keepdims=True)                        # exact softmax
            attn_out = attn_out + jnp.dot(p, v, preferred_element_type=jnp.float32)

        out1 = attn_out + bo + x                                              # W_o bias + residual

        # ---- PositionwiseFeedForward (pre-LN, eps = 1e-6) on the full slab ----
        mu2 = jnp.mean(out1, axis=-1, keepdims=True)
        var2 = jnp.mean((out1 - mu2) ** 2, axis=-1, keepdims=True)
        ln = (out1 - mu2) * lax.rsqrt(var2 + 1e-6) * ln_g + ln_b
        w1 = w_ref[li, QKW_R:QKW_R + D, 2 * D:2 * D + D_FF]                   # (D, D_FF)
        w2 = w_ref[li, W2_R:W2_R + D_FF, :D]                                  # (D_FF, D)
        inter = jnp.maximum(jnp.dot(ln, w1, preferred_element_type=jnp.float32) + b1, 0.0)
        ffn = jnp.dot(inter, w2, preferred_element_type=jnp.float32) + b2
        x = ffn + out1                                                        # residual

    # ---- fused dense @ out_proj head on the full slab; lane-dense (16,128) store ----
    head_w = vec_ref[HEAD_W_R:HEAD_W_R + D, :]        # (D, 128), cols >= NUM_LABELS are 0
    head_b = vec_ref[HEAD_B_R:HEAD_B_R + 1, :]        # (1, 128)
    o_ref[...] = jnp.dot(x, head_w, preferred_element_type=jnp.float32) + head_b


# ------------------------------- wrapper -------------------------------------
def fused_forward_pallas(emb2d, mask_add, vecs, wl):
    vmem = lambda: pl.BlockSpec(memory_space=pltpu.MemorySpace.VMEM)
    # TODO(synk): if batch/seq grow, add a leading "parallel" grid axis over batch
    #             so Mosaic can shard across v7x's two TensorCores.
    return pl.pallas_call(
        _fused_forward_kernel,
        out_shape=jax.ShapeDtypeStruct((B * S, LANE), jnp.float32),
        in_specs=[vmem(), vmem(), vmem(), vmem()],   # 4 whole-array VMEM inputs, no grid
        out_specs=vmem(),
    )(emb2d, mask_add, vecs, wl)


# ------------------------------ parameters -----------------------------------
def init_params(key):
    keys = jax.random.split(key, 8 + NUM_LAYERS)

    def nrm(k, shape, scale=0.02):
        return (scale * jax.random.normal(k, shape)).astype(jnp.float32)

    word_emb = nrm(keys[0], (VOCAB, D_MODEL)).at[PAD_ID].set(0.0)   # padding_idx row = 0
    params = {
        "word_emb": word_emb,
        "pos_emb": nrm(keys[1], (MAX_POS, D_MODEL)),
        "emb_ln_g": jnp.ones((1, D_MODEL), jnp.float32),
        "emb_ln_b": jnp.zeros((1, D_MODEL), jnp.float32),
        "dense_w": nrm(keys[2], (D_MODEL, D_MODEL)),
        "dense_b": nrm(keys[3], (1, D_MODEL)),
        "proj_w": nrm(keys[4], (D_MODEL, NUM_LABELS)),
        "proj_b": nrm(keys[5], (1, NUM_LABELS)),
        "layers": [],
    }
    for li in range(NUM_LAYERS):
        lk = jax.random.split(keys[8 + li], 12)
        params["layers"].append({
            "wq": nrm(lk[0], (D_MODEL, D_MODEL)), "bq": nrm(lk[1], (1, D_MODEL)),
            "wk": nrm(lk[2], (D_MODEL, D_MODEL)), "bk": nrm(lk[3], (1, D_MODEL)),
            "wv": nrm(lk[4], (D_MODEL, D_MODEL)), "bv": nrm(lk[5], (1, D_MODEL)),
            "wo": nrm(lk[6], (D_MODEL, D_MODEL)), "bo": nrm(lk[7], (1, D_MODEL)),
            "ln_g": jnp.ones((1, D_MODEL), jnp.float32),
            "ln_b": jnp.zeros((1, D_MODEL), jnp.float32),
            "w1": nrm(lk[8], (D_MODEL, D_FF)), "b1": nrm(lk[9], (1, D_FF)),
            "w2": nrm(lk[10], (D_FF, D_MODEL)), "b2": nrm(lk[11], (1, D_MODEL)),
        })
    return params


def prepare_fused_params(params):
    """Pack everything into 2 kernel inputs (one bias/head slab + one weight slab)."""
    hp = lax.Precision.HIGHEST
    scale = 1.0 / math.sqrt(DH)

    vecs = jnp.zeros((VEC_ROWS, LANE), jnp.float32)
    vecs = vecs.at[EMB_G_R, :D_MODEL].set(params["emb_ln_g"][0])
    vecs = vecs.at[EMB_B_R, :D_MODEL].set(params["emb_ln_b"][0])

    wl = jnp.zeros((NUM_LAYERS, WL_ROWS, WL_COLS), jnp.float32)
    for li, lp in enumerate(params["layers"]):
        r0 = LAYER_R0 + li * ROWS_PER_LAYER
        # fold 1/sqrt(d_head) into the query projection (weight and bias)
        vecs = vecs.at[r0 + 0, :D_MODEL].set(lp["bq"][0] * scale)
        vecs = vecs.at[r0 + 1, :D_MODEL].set(lp["bk"][0])
        # fold W_o per head into the value projection: Wvo_h = Wv_h @ Wo_h (exact)
        wvo = jnp.zeros((D_MODEL, HEADS * D_MODEL), jnp.float32)
        bvo = jnp.zeros((HEADS * D_MODEL,), jnp.float32)
        for h in range(HEADS):
            wo_h = lp["wo"][h * DH:(h + 1) * DH, :]
            wvo = wvo.at[:, h * D_MODEL:(h + 1) * D_MODEL].set(
                jnp.dot(lp["wv"][:, h * DH:(h + 1) * DH], wo_h, precision=hp))
            bvo = bvo.at[h * D_MODEL:(h + 1) * D_MODEL].set(
                jnp.dot(lp["bv"][0, h * DH:(h + 1) * DH], wo_h, precision=hp))
        vecs = vecs.at[r0 + 2, :].set(bvo)
        vecs = vecs.at[r0 + 3, :D_MODEL].set(lp["bo"][0])
        vecs = vecs.at[r0 + 4, :D_MODEL].set(lp["ln_g"][0])
        vecs = vecs.at[r0 + 5, :D_MODEL].set(lp["ln_b"][0])
        vecs = vecs.at[r0 + 6, :D_FF].set(lp["b1"][0])
        vecs = vecs.at[r0 + 7, :D_MODEL].set(lp["b2"][0])

        wl = wl.at[li, WVO_R:WVO_R + D_MODEL, :].set(wvo)
        wl = wl.at[li, QKW_R:QKW_R + D_MODEL, 0:D_MODEL].set(lp["wq"] * scale)
        wl = wl.at[li, QKW_R:QKW_R + D_MODEL, D_MODEL:2 * D_MODEL].set(lp["wk"])
        wl = wl.at[li, QKW_R:QKW_R + D_MODEL, 2 * D_MODEL:2 * D_MODEL + D_FF].set(lp["w1"])
        wl = wl.at[li, W2_R:W2_R + D_FF, 0:D_MODEL].set(lp["w2"])

    # dense -> out_proj has no nonlinearity in between => exact algebraic fusion,
    # padded to a lane-dense 128-wide head (sliced back to NUM_LABELS outside).
    head_w = jnp.dot(params["dense_w"], params["proj_w"], precision=hp)          # (D, 3)
    head_b = (jnp.dot(params["dense_b"], params["proj_w"], precision=hp)
              + params["proj_b"])[0]                                             # (3,)
    vecs = vecs.at[HEAD_B_R, :NUM_LABELS].set(head_b)
    vecs = vecs.at[HEAD_W_R:HEAD_W_R + D_MODEL, :NUM_LABELS].set(head_w)

    return {"vecs": vecs, "wl": wl}


# ------------------------------- forward --------------------------------------
def classification_head_forward(params, fused, input_ids, lengths):
    # TODO(synk): word/position embedding table gathers + position-id cumsum stay
    #             in plain JAX glue; a dynamic vocab gather has no clean
    #             Pallas-TPU expression at this size.
    tok_mask = (input_ids != PAD_ID).astype(jnp.int32)
    position_ids = jnp.cumsum(tok_mask, axis=1) * tok_mask + PAD_ID
    emb = params["word_emb"][input_ids] + params["pos_emb"][position_ids]        # (B,S,D)
    emb2d = emb.reshape(B * S, D_MODEL).astype(jnp.float32)

    # additive attention bias over the flattened (batch*seq) key axis:
    # 0 where (same batch AND key is a real token), -1e18 otherwise.
    key_valid = (jnp.arange(S)[None, :] < lengths[:, None]).reshape(B * S)       # (B*S,)
    batch_idx = jnp.repeat(jnp.arange(B), S)                                     # (B*S,)
    allowed = (batch_idx[:, None] == batch_idx[None, :]) & key_valid[None, :]
    mask_add = jnp.where(allowed, 0.0, NEG_INF).astype(jnp.float32)              # (B*S,B*S)

    out = fused_forward_pallas(emb2d, mask_add, fused["vecs"], fused["wl"])      # (B*S,128)
    return out.reshape(B, S, LANE)[:, 0, :NUM_LABELS]


# --------------------------- pure-JAX reference --------------------------------
def _ref_layernorm(x, g, b, eps):
    mu = jnp.mean(x, axis=-1, keepdims=True)
    var = jnp.mean((x - mu) ** 2, axis=-1, keepdims=True)
    return (x - mu) * lax.rsqrt(var + eps) * g + b


def reference_forward(params, input_ids, lengths):
    hp = lax.Precision.HIGHEST
    tok_mask = (input_ids != PAD_ID).astype(jnp.int32)
    position_ids = jnp.cumsum(tok_mask, axis=1) * tok_mask + PAD_ID
    x = params["word_emb"][input_ids] + params["pos_emb"][position_ids]
    x = _ref_layernorm(x, params["emb_ln_g"][0], params["emb_ln_b"][0], 1e-5)
    key_mask = jnp.arange(S)[None, :] >= lengths[:, None]                        # True = pad
    for lp in params["layers"]:
        q = jnp.einsum('bsd,de->bse', x, lp["wq"], precision=hp) + lp["bq"][0]
        k = jnp.einsum('bsd,de->bse', x, lp["wk"], precision=hp) + lp["bk"][0]
        v = jnp.einsum('bsd,de->bse', x, lp["wv"], precision=hp) + lp["bv"][0]
        split = lambda t: t.reshape(B, S, HEADS, DH).transpose(0, 2, 1, 3)
        qh, kh, vh = split(q) / math.sqrt(DH), split(k), split(v)
        scores = jnp.einsum('bhqd,bhkd->bhqk', qh, kh, precision=hp)
        scores = jnp.where(key_mask[:, None, None, :], NEG_INF, scores)
        attn = jax.nn.softmax(scores, axis=-1)
        ctx = jnp.einsum('bhqk,bhkd->bhqd', attn, vh, precision=hp)
        ctx = ctx.transpose(0, 2, 1, 3).reshape(B, S, D_MODEL)
        attn_out = jnp.einsum('bsd,de->bse', ctx, lp["wo"], precision=hp) + lp["bo"][0]
        out1 = attn_out + x
        ln = _ref_layernorm(out1, lp["ln_g"][0], lp["ln_b"][0], 1e-6)
        inter = jax.nn.relu(jnp.einsum('bsd,df->bsf', ln, lp["w1"], precision=hp) + lp["b1"][0])
        x = jnp.einsum('bsf,fd->bsd', inter, lp["w2"], precision=hp) + lp["b2"][0] + out1
    h = jnp.einsum('bd,de->be', x[:, 0, :], params["dense_w"], precision=hp) + params["dense_b"][0]
    return jnp.einsum('bd,dn->bn', h, params["proj_w"], precision=hp) + params["proj_b"][0]


# --------------------------------- main ----------------------------------------
if __name__ == "__main__":
    key = jax.random.PRNGKey(0)
    k_param, k_tok = jax.random.split(key)

    params = init_params(k_param)
    fused = prepare_fused_params(params)

    lengths = jnp.array([S, 5], dtype=jnp.int32)       # max length == S (sequence_mask)
    input_ids = jax.random.randint(k_tok, (B, S), 2, VOCAB, dtype=jnp.int32)
    pad_positions = jnp.arange(S)[None, :] >= lengths[:, None]
    input_ids = jnp.where(pad_positions, PAD_ID, input_ids)

    logits = classification_head_forward(params, fused, input_ids, lengths)
    jax.block_until_ready(logits)
    assert logits.shape == (B, NUM_LABELS)

    # pure-JAX cross-check (exact softmax in-kernel -> tighter tolerance than before)
    ref = reference_forward(params, input_ids, lengths)
    max_err = float(jnp.max(jnp.abs(logits - ref)))
    assert max_err < 1e-3, f"mismatch vs pure-JAX reference: {max_err}"

    print("KERNEL_OK")
</pallas_src>

<mosaic_0001>
module attributes {stable_mosaic.version = 11 : i64} {
  func.func @_fused_forward_kernel(%arg0: memref<16x32xf32, #tpu.memory_space<vmem>>, %arg1: memref<16x16xf32, #tpu.memory_space<vmem>>, %arg2: memref<56x128xf32, #tpu.memory_space<vmem>>, %arg3: memref<2x128x128xf32, #tpu.memory_space<vmem>>, %arg4: memref<16x128xf32, #tpu.memory_space<vmem>>) attributes {dimension_semantics = [], scalar_prefetch = 0 : i64, scratch_operands = 0 : i64, tpu.core_type = #tpu.core_type<tc>} {
    %c0 = arith.constant 0 : index
    %c0_0 = arith.constant 0 : index
    %0 = vector.load %arg0[%c0, %c0_0] : memref<16x32xf32, #tpu.memory_space<vmem>>, vector<16x32xf32>
    %c0_1 = arith.constant 0 : index
    %c0_2 = arith.constant 0 : index
    %1 = vector.load %arg2[%c0_1, %c0_2] : memref<56x128xf32, #tpu.memory_space<vmem>>, vector<1x32xf32>
    %c1 = arith.constant 1 : index
    %c0_3 = arith.constant 0 : index
    %2 = vector.load %arg2[%c1, %c0_3] : memref<56x128xf32, #tpu.memory_space<vmem>>, vector<1x32xf32>
    %cst = arith.constant dense<0.000000e+00> : vector<16xf32>
    %3 = vector.multi_reduction <add>, %0, %cst [1] : vector<16x32xf32> to vector<16xf32>
    %4 = vector.shape_cast %3 : vector<16xf32> to vector<16x1xf32>
    %cst_4 = arith.constant 3.200000e+01 : f32
    %5 = vector.broadcast %cst_4 : f32 to vector<16x1xf32>
    %6 = arith.divf %4, %5 : vector<16x1xf32>
    %7 = vector.broadcast %6 : vector<16x1xf32> to vector<16x32xf32>
    %8 = arith.subf %0, %7 : vector<16x32xf32>
    %9 = arith.mulf %8, %8 : vector<16x32xf32>
    %cst_5 = arith.constant dense<0.000000e+00> : vector<16xf32>
    %10 = vector.multi_reduction <add>, %9, %cst_5 [1] : vector<16x32xf32> to vector<16xf32>
    %11 = vector.shape_cast %10 : vector<16xf32> to vector<16x1xf32>
    %cst_6 = arith.constant 3.200000e+01 : f32
    %12 = vector.broadcast %cst_6 : f32 to vector<16x1xf32>
    %13 = arith.divf %11, %12 : vector<16x1xf32>
    %14 = vector.broadcast %6 : vector<16x1xf32> to vector<16x32xf32>
    %15 = arith.subf %0, %14 : vector<16x32xf32>
    %cst_7 = arith.constant 9.99999974E-6 : f32
    %16 = vector.broadcast %cst_7 : f32 to vector<16x1xf32>
    %17 = arith.addf %13, %16 : vector<16x1xf32>
    %18 = math.rsqrt %17 : vector<16x1xf32>
    %19 = vector.broadcast %18 : vector<16x1xf32> to vector<16x32xf32>
    %20 = arith.mulf %15, %19 : vector<16x32xf32>
    %21 = vector.broadcast %1 : vector<1x32xf32> to vector<16x32xf32>
    %22 = arith.mulf %20, %21 : vector<16x32xf32>
    %23 = vector.broadcast %2 : vector<1x32xf32> to vector<16x32xf32>
    %24 = arith.addf %22, %23 : vector<16x32xf32>
    %c0_8 = arith.constant 0 : index
    %c0_9 = arith.constant 0 : index
    %25 = vector.load %arg1[%c0_8, %c0_9] : memref<16x16xf32, #tpu.memory_space<vmem>>, vector<16x16xf32>
    %c5 = arith.constant 5 : index
    %c0_10 = arith.constant 0 : index
    %26 = vector.load %arg2[%c5, %c0_10] : memref<56x128xf32, #tpu.memory_space<vmem>>, vector<1x32xf32>
    %c6 = arith.constant 6 : index
    %c0_11 = arith.constant 0 : index
    %27 = vector.load %arg2[%c6, %c0_11] : memref<56x128xf32, #tpu.memory_space<vmem>>, vector<1x32xf32>
    %c7 = arith.constant 7 : index
    %c0_12 = arith.constant 0 : index
    %28 = vector.load %arg2[%c7, %c0_12] : memref<56x128xf32, #tpu.memory_space<vmem>>, vector<1x32xf32>
    %c8 = arith.constant 8 : index
    %c0_13 = arith.constant 0 : index
    %29 = vector.load %arg2[%c8, %c0_13] : memref<56x128xf32, #tpu.memory_space<vmem>>, vector<1x64xf32>
    %c9 = arith.constant 9 : index
    %c0_14 = arith.constant 0 : index
    %30 = vector.load %arg2[%c9, %c0_14] : memref<56x128xf32, #tpu.memory_space<vmem>>, vector<1x32xf32>
    %cst_15 = arith.constant 0.000000e+00 : f32
    %31 = vector.broadcast %cst_15 : f32 to vector<16x32xf32>
    %c0_16 = arith.constant 0 : index
    %c32 = arith.constant 32 : index
    %c0_17 = arith.constant 0 : index
    %32 = vector.load %arg3[%c0_16, %c32, %c0_17] : memref<2x128x128xf32, #tpu.memory_space<vmem>>, vector<1x32x8xf32>
    %33 = vector.shape_cast %32 : vector<1x32x8xf32> to vector<32x8xf32>
    %c0_18 = arith.constant 0 : index
    %c32_19 = arith.constant 32 : index
    %c32_20 = arith.constant 32 : index
    %34 = vector.load %arg3[%c0_18, %c32_19, %c32_20] : memref<2x128x128xf32, #tpu.memory_space<vmem>>, vector<1x32x8xf32>
    %35 = vector.shape_cast %34 : vector<1x32x8xf32> to vector<32x8xf32>
    %c0_21 = arith.constant 0 : index
    %c0_22 = arith.constant 0 : index
    %c0_23 = arith.constant 0 : index
    %36 = vector.load %arg3[%c0_21, %c0_22, %c0_23] : memref<2x128x128xf32, #tpu.memory_space<vmem>>, vector<1x32x32xf32>
    %37 = vector.shape_cast %36 : vector<1x32x32xf32> to vector<32x32xf32>
    %c2 = arith.constant 2 : index
    %c0_24 = arith.constant 0 : index
    %38 = vector.load %arg2[%c2, %c0_24] : memref<56x128xf32, #tpu.memory_space<vmem>>, vector<1x8xf32>
    %c3 = arith.constant 3 : index
    %c0_25 = arith.constant 0 : index
    %39 = vector.load %arg2[%c3, %c0_25] : memref<56x128xf32, #tpu.memory_space<vmem>>, vector<1x8xf32>
    %c4 = arith.constant 4 : index
    %c0_26 = arith.constant 0 : index
    %40 = vector.load %arg2[%c4, %c0_26] : memref<56x128xf32, #tpu.memory_space<vmem>>, vector<1x32xf32>
    %cst_27 = arith.constant dense<0.000000e+00> : vector<16x8xf32>
    %41 = tpu.matmul %24, %33, %cst_27 {dimension_numbers = #tpu.dot_dimension_numbers<[1], [0], [0], [1], [0, 0, 1, 1], [], []>} : vector<16x32xf32>, vector<32x8xf32>, vector<16x8xf32> -> vector<16x8xf32>
    %42 = vector.broadcast %38 : vector<1x8xf32> to vector<16x8xf32>
    %43 = arith.addf %41, %42 : vector<16x8xf32>
    %cst_28 = arith.constant dense<0.000000e+00> : vector<16x8xf32>
    %44 = tpu.matmul %24, %35, %cst_28 {dimension_numbers = #tpu.dot_dimension_numbers<[1], [0], [0], [1], [0, 0, 1, 1], [], []>} : vector<16x32xf32>, vector<32x8xf32>, vector<16x8xf32> -> vector<16x8xf32>
    %45 = vector.broadcast %39 : vector<1x8xf32> to vector<16x8xf32>
    %46 = arith.addf %44, %45 : vector<16x8xf32>
    %cst_29 = arith.constant dense<0.000000e+00> : vector<16x32xf32>
    %47 = tpu.matmul %24, %37, %cst_29 {dimension_numbers = #tpu.dot_dimension_numbers<[1], [0], [0], [1], [0, 0, 1, 1], [], []>} : vector<16x32xf32>, vector<32x32xf32>, vector<16x32xf32> -> vector<16x32xf32>
    %48 = vector.broadcast %40 : vector<1x32xf32> to vector<16x32xf32>
    %49 = arith.addf %47, %48 : vector<16x32xf32>
    %cst_30 = arith.constant dense<0.000000e+00> : vector<16x16xf32>
    %50 = tpu.matmul %43, %46, %cst_30 {dimension_numbers = #tpu.dot_dimension_numbers<[1], [1], [0], [0], [0, 0, 1, 0], [], []>} : vector<16x8xf32>, vector<16x8xf32>, vector<16x16xf32> -> vector<16x16xf32>
    %51 = arith.addf %50, %25 : vector<16x16xf32>
    %cst_31 = arith.constant dense<0xFF800000> : vector<16xf32>
    %52 = vector.multi_reduction <maximumf>, %51, %cst_31 [1] : vector<16x16xf32> to vector<16xf32>
    %53 = vector.shape_cast %52 : vector<16xf32> to vector<16x1xf32>
    %54 = vector.broadcast %53 : vector<16x1xf32> to vector<16x16xf32>
    %55 = arith.subf %51, %54 : vector<16x16xf32>
    %56 = math.exp %55 : vector<16x16xf32>
    %cst_32 = arith.constant dense<0.000000e+00> : vector<16xf32>
    %57 = vector.multi_reduction <add>, %56, %cst_32 [1] : vector<16x16xf32> to vector<16xf32>
    %58 = vector.shape_cast %57 : vector<16xf32> to vector<16x1xf32>
    %59 = vector.broadcast %58 : vector<16x1xf32> to vector<16x16xf32>
    %60 = arith.divf %56, %59 : vector<16x16xf32>
    %cst_33 = arith.constant dense<0.000000e+00> : vector<16x32xf32>
    %61 = tpu.matmul %60, %49, %cst_33 {dimension_numbers = #tpu.dot_dimension_numbers<[1], [0], [0], [1], [0, 0, 1, 1], [], []>} : vector<16x16xf32>, vector<16x32xf32>, vector<16x32xf32> -> vector<16x32xf32>
    %62 = arith.addf %31, %61 : vector<16x32xf32>
    %c0_34 = arith.constant 0 : index
    %c32_35 = arith.constant 32 : index
    %c8_36 = arith.constant 8 : index
    %63 = vector.load %arg3[%c0_34, %c32_35, %c8_36] : memref<2x128x128xf32, #tpu.memory_space<vmem>>, vector<1x32x8xf32>
    %64 = vector.shape_cast %63 : vector<1x32x8xf32> to vector<32x8xf32>
    %c0_37 = arith.constant 0 : index
    %c32_38 = arith.constant 32 : index
    %c40 = arith.constant 40 : index
    %65 = vector.load %arg3[%c0_37, %c32_38, %c40] : memref<2x128x128xf32, #tpu.memory_space<vmem>>, vector<1x32x8xf32>
    %66 = vector.shape_cast %65 : vector<1x32x8xf32> to vector<32x8xf32>
    %c0_39 = arith.constant 0 : index
    %c0_40 = arith.constant 0 : index
    %c32_41 = arith.constant 32 : index
    %67 = vector.load %arg3[%c0_39, %c0_40, %c32_41] : memref<2x128x128xf32, #tpu.memory_space<vmem>>, vector<1x32x32xf32>
    %68 = vector.shape_cast %67 : vector<1x32x32xf32> to vector<32x32xf32>
    %c2_42 = arith.constant 2 : index
    %c8_43 = arith.constant 8 : index
    %69 = vector.load %arg2[%c2_42, %c8_43] : memref<56x128xf32, #tpu.memory_space<vmem>>, vector<1x8xf32>
    %c3_44 = arith.constant 3 : index
    %c8_45 = arith.constant 8 : index
    %70 = vector.load %arg2[%c3_44, %c8_45] : memref<56x128xf32, #tpu.memory_space<vmem>>, vector<1x8xf32>
    %c4_46 = arith.constant 4 : index
    %c32_47 = arith.constant 32 : index
    %71 = vector.load %arg2[%c4_46, %c32_47] : memref<56x128xf32, #tpu.memory_space<vmem>>, vector<1x32xf32>
    %cst_48 = arith.constant dense<0.000000e+00> : vector<16x8xf32>
    %72 = tpu.matmul %24, %64, %cst_48 {dimension_numbers = #tpu.dot_dimension_numbers<[1], [0], [0], [1], [0, 0, 1, 1], [], []>} : vector<16x32xf32>, vector<32x8xf32>, vector<16x8xf32> -> vector<16x8xf32>
    %73 = vector.broadcast %69 : vector<1x8xf32> to vector<16x8xf32>
    %74 = arith.addf %72, %73 : vector<16x8xf32>
    %cst_49 = arith.constant dense<0.000000e+00> : vector<16x8xf32>
    %75 = tpu.matmul %24, %66, %cst_49 {dimension_numbers = #tpu.dot_dimension_numbers<[1], [0], [0], [1], [0, 0, 1, 1], [], []>} : vector<16x32xf32>, vector<32x8xf32>, vector<16x8xf32> -> vector<16x8xf32>
    %76 = vector.broadcast %70 : vector<1x8xf32> to vector<16x8xf32>
    %77 = arith.addf %75, %76 : vector<16x8xf32>
    %cst_50 = arith.constant dense<0.000000e+00> : vector<16x32xf32>
    %78 = tpu.matmul %24, %68, %cst_50 {dimension_numbers = #tpu.dot_dimension_numbers<[1], [0], [0], [1], [0, 0, 1, 1], [], []>} : vector<16x32xf32>, vector<32x32xf32>, vector<16x32xf32> -> vector<16x32xf32>
    %79 = vector.broadcast %71 : vector<1x32xf32> to vector<16x32xf32>
    %80 = arith.addf %78, %79 : vector<16x32xf32>
    %cst_51 = arith.constant dense<0.000000e+00> : vector<16x16xf32>
    %81 = tpu.matmul %74, %77, %cst_51 {dimension_numbers = #tpu.dot_dimension_numbers<[1], [1], [0], [0], [0, 0, 1, 0], [], []>} : vector<16x8xf32>, vector<16x8xf32>, vector<16x16xf32> -> vector<16x16xf32>
    %82 = arith.addf %81, %25 : vector<16x16xf32>
    %cst_52 = arith.constant dense<0xFF800000> : vector<16xf32>
    %83 = vector.multi_reduction <maximumf>, %82, %cst_52 [1] : vector<16x16xf32> to vector<16xf32>
    %84 = vector.shape_cast %83 : vector<16xf32> to vector<16x1xf32>
    %85 = vector.broadcast %84 : vector<16x1xf32> to vector<16x16xf32>
    %86 = arith.subf %82, %85 : vector<16x16xf32>
    %87 = math.exp %86 : vector<16x16xf32>
    %cst_53 = arith.constant dense<0.000000e+00> : vector<16xf32>
    %88 = vector.multi_reduction <add>, %87, %cst_53 [1] : vector<16x16xf32> to vector<16xf32>
    %89 = vector.shape_cast %88 : vector<16xf32> to vector<16x1xf32>
    %90 = vector.broadcast %89 : vector<16x1xf32> to vector<16x16xf32>
    %91 = arith.divf %87, %90 : vector<16x16xf32>
    %cst_54 = arith.constant dense<0.000000e+00> : vector<16x32xf32>
    %92 = tpu.matmul %91, %80, %cst_54 {dimension_numbers = #tpu.dot_dimension_numbers<[1], [0], [0], [1], [0, 0, 1, 1], [], []>} : vector<16x16xf32>, vector<16x32xf32>, vector<16x32xf32> -> vector<16x32xf32>
    %93 = arith.addf %62, %92 : vector<16x32xf32>
    %c0_55 = arith.constant 0 : index
    %c32_56 = arith.constant 32 : index
    %c16 = arith.constant 16 : index
    %94 = vector.load %arg3[%c0_55, %c32_56, %c16] : memref<2x128x128xf32, #tpu.memory_space<vmem>>, vector<1x32x8xf32>
    %95 = vector.shape_cast %94 : vector<1x32x8xf32> to vector<32x8xf32>
    %c0_57 = arith.constant 0 : index
    %c32_58 = arith.constant 32 : index
    %c48 = arith.constant 48 : index
    %96 = vector.load %arg3[%c0_57, %c32_58, %c48] : memref<2x128x128xf32, #tpu.memory_space<vmem>>, vector<1x32x8xf32>
    %97 = vector.shape_cast %96 : vector<1x32x8xf32> to vector<32x8xf32>
    %c0_59 = arith.constant 0 : index
    %c0_60 = arith.constant 0 : index
    %c64 = arith.constant 64 : index
    %98 = vector.load %arg3[%c0_59, %c0_60, %c64] : memref<2x128x128xf32, #tpu.memory_space<vmem>>, vector<1x32x32xf32>
    %99 = vector.shape_cast %98 : vector<1x32x32xf32> to vector<32x32xf32>
    %c2_61 = arith.constant 2 : index
    %c16_62 = arith.constant 16 : index
    %100 = vector.load %arg2[%c2_61, %c16_62] : memref<56x128xf32, #tpu.memory_space<vmem>>, vector<1x8xf32>
    %c3_63 = arith.constant 3 : index
    %c16_64 = arith.constant 16 : index
    %101 = vector.load %arg2[%c3_63, %c16_64] : memref<56x128xf32, #tpu.memory_space<vmem>>, vector<1x8xf32>
    %c4_65 = arith.constant 4 : index
    %c64_66 = arith.constant 64 : index
    %102 = vector.load %arg2[%c4_65, %c64_66] : memref<56x128xf32, #tpu.memory_space<vmem>>, vector<1x32xf32>
    %cst_67 = arith.constant dense<0.000000e+00> : vector<16x8xf32>
    %103 = tpu.matmul %24, %95, %cst_67 {dimension_numbers = #tpu.dot_dimension_numbers<[1], [0], [0], [1], [0, 0, 1, 1], [], []>} : vector<16x32xf32>, vector<32x8xf32>, vector<16x8xf32> -> vector<16x8xf32>
    %104 = vector.broadcast %100 : vector<1x8xf32> to vector<16x8xf32>
    %105 = arith.addf %103, %104 : vector<16x8xf32>
    %cst_68 = arith.constant dense<0.000000e+00> : vector<16x8xf32>
    %106 = tpu.matmul %24, %97, %cst_68 {dimension_numbers = #tpu.dot_dimension_numbers<[1], [0], [0], [1], [0, 0, 1, 1], [], []>} : vector<16x32xf32>, vector<32x8xf32>, vector<16x8xf32> -> vector<16x8xf32>
    %107 = vector.broadcast %101 : vector<1x8xf32> to vector<16x8xf32>
    %108 = arith.addf %106, %107 : vector<16x8xf32>
    %cst_69 = arith.constant dense<0.000000e+00> : vector<16x32xf32>
    %109 = tpu.matmul %24, %99, %cst_69 {dimension_numbers = #tpu.dot_dimension_numbers<[1], [0], [0], [1], [0, 0, 1, 1], [], []>} : vector<16x32xf32>, vector<32x32xf32>, vector<16x32xf32> -> vector<16x32xf32>
    %110 = vector.broadcast %102 : vector<1x32xf32> to vector<16x32xf32>
    %111 = arith.addf %109, %110 : vector<16x32xf32>
    %cst_70 = arith.constant dense<0.000000e+00> : vector<16x16xf32>
    %112 = tpu.matmul %105, %108, %cst_70 {dimension_numbers = #tpu.dot_dimension_numbers<[1], [1], [0], [0], [0, 0, 1, 0], [], []>} : vector<16x8xf32>, vector<16x8xf32>, vector<16x16xf32> -> vector<16x16xf32>
    %113 = arith.addf %112, %25 : vector<16x16xf32>
    %cst_71 = arith.constant dense<0xFF800000> : vector<16xf32>
    %114 = vector.multi_reduction <maximumf>, %113, %cst_71 [1] : vector<16x16xf32> to vector<16xf32>
    %115 = vector.shape_cast %114 : vector<16xf32> to vector<16x1xf32>
    %116 = vector.broadcast %115 : vector<16x1xf32> to vector<16x16xf32>
    %117 = arith.subf %113, %116 : vector<16x16xf32>
    %118 = math.exp %117 : vector<16x16xf32>
    %cst_72 = arith.constant dense<0.000000e+00> : vector<16xf32>
    %119 = vector.multi_reduction <add>, %118, %cst_72 [1] : vector<16x16xf32> to vector<16xf32>
    %120 = vector.shape_cast %119 : vector<16xf32> to vector<16x1xf32>
    %121 = vector.broadcast %120 : vector<16x1xf32> to vector<16x16xf32>
    %122 = arith.divf %118, %121 : vector<16x16xf32>
    %cst_73 = arith.constant dense<0.000000e+00> : vector<16x32xf32>
    %123 = tpu.matmul %122, %111, %cst_73 {dimension_numbers = #tpu.dot_dimension_numbers<[1], [0], [0], [1], [0, 0, 1, 1], [], []>} : vector<16x16xf32>, vector<16x32xf32>, vector<16x32xf32> -> vector<16x32xf32>
    %124 = arith.addf %93, %123 : vector<16x32xf32>
    %c0_74 = arith.constant 0 : index
    %c32_75 = arith.constant 32 : index
    %c24 = arith.constant 24 : index
    %125 = vector.load %arg3[%c0_74, %c32_75, %c24] : memref<2x128x128xf32, #tpu.memory_space<vmem>>, vector<1x32x8xf32>
    %126 = vector.shape_cast %125 : vector<1x32x8xf32> to vector<32x8xf32>
    %c0_76 = arith.constant 0 : index
    %c32_77 = arith.constant 32 : index
    %c56 = arith.constant 56 : index
    %127 = vector.load %arg3[%c0_76, %c32_77, %c56] : memref<2x128x128xf32, #tpu.memory_space<vmem>>, vector<1x32x8xf32>
    %128 = vector.shape_cast %127 : vector<1x32x8xf32> to vector<32x8xf32>
    %c0_78 = arith.constant 0 : index
    %c0_79 = arith.constant 0 : index
    %c96 = arith.constant 96 : index
    %129 = vector.load %arg3[%c0_78, %c0_79, %c96] : memref<2x128x128xf32, #tpu.memory_space<vmem>>, vector<1x32x32xf32>
    %130 = vector.shape_cast %129 : vector<1x32x32xf32> to vector<32x32xf32>
    %c2_80 = arith.constant 2 : index
    %c24_81 = arith.constant 24 : index
    %131 = vector.load %arg2[%c2_80, %c24_81] : memref<56x128xf32, #tpu.memory_space<vmem>>, vector<1x8xf32>
    %c3_82 = arith.constant 3 : index
    %c24_83 = arith.constant 24 : index
    %132 = vector.load %arg2[%c3_82, %c24_83] : memref<56x128xf32, #tpu.memory_space<vmem>>, vector<1x8xf32>
    %c4_84 = arith.constant 4 : index
    %c96_85 = arith.constant 96 : index
    %133 = vector.load %arg2[%c4_84, %c96_85] : memref<56x128xf32, #tpu.memory_space<vmem>>, vector<1x32xf32>
    %cst_86 = arith.constant dense<0.000000e+00> : vector<16x8xf32>
    %134 = tpu.matmul %24, %126, %cst_86 {dimension_numbers = #tpu.dot_dimension_numbers<[1], [0], [0], [1], [0, 0, 1, 1], [], []>} : vector<16x32xf32>, vector<32x8xf32>, vector<16x8xf32> -> vector<16x8xf32>
    %135 = vector.broadcast %131 : vector<1x8xf32> to vector<16x8xf32>
    %136 = arith.addf %134, %135 : vector<16x8xf32>
    %cst_87 = arith.constant dense<0.000000e+00> : vector<16x8xf32>
    %137 = tpu.matmul %24, %128, %cst_87 {dimension_numbers = #tpu.dot_dimension_numbers<[1], [0], [0], [1], [0, 0, 1, 1], [], []>} : vector<16x32xf32>, vector<32x8xf32>, vector<16x8xf32> -> vector<16x8xf32>
    %138 = vector.broadcast %132 : vector<1x8xf32> to vector<16x8xf32>
    %139 = arith.addf %137, %138 : vector<16x8xf32>
    %cst_88 = arith.constant dense<0.000000e+00> : vector<16x32xf32>
    %140 = tpu.matmul %24, %130, %cst_88 {dimension_numbers = #tpu.dot_dimension_numbers<[1], [0], [0], [1], [0, 0, 1, 1], [], []>} : vector<16x32xf32>, vector<32x32xf32>, vector<16x32xf32> -> vector<16x32xf32>
    %141 = vector.broadcast %133 : vector<1x32xf32> to vector<16x32xf32>
    %142 = arith.addf %140, %141 : vector<16x32xf32>
    %cst_89 = arith.constant dense<0.000000e+00> : vector<16x16xf32>
    %143 = tpu.matmul %136, %139, %cst_89 {dimension_numbers = #tpu.dot_dimension_numbers<[1], [1], [0], [0], [0, 0, 1, 0], [], []>} : vector<16x8xf32>, vector<16x8xf32>, vector<16x16xf32> -> vector<16x16xf32>
    %144 = arith.addf %143, %25 : vector<16x16xf32>
    %cst_90 = arith.constant dense<0xFF800000> : vector<16xf32>
    %145 = vector.multi_reduction <maximumf>, %144, %cst_90 [1] : vector<16x16xf32> to vector<16xf32>
    %146 = vector.shape_cast %145 : vector<16xf32> to vector<16x1xf32>
    %147 = vector.broadcast %146 : vector<16x1xf32> to vector<16x16xf32>
    %148 = arith.subf %144, %147 : vector<16x16xf32>
    %149 = math.exp %148 : vector<16x16xf32>
    %cst_91 = arith.constant dense<0.000000e+00> : vector<16xf32>
    %150 = vector.multi_reduction <add>, %149, %cst_91 [1] : vector<16x16xf32> to vector<16xf32>
    %151 = vector.shape_cast %150 : vector<16xf32> to vector<16x1xf32>
    %152 = vector.broadcast %151 : vector<16x1xf32> to vector<16x16xf32>
    %153 = arith.divf %149, %152 : vector<16x16xf32>
    %cst_92 = arith.constant dense<0.000000e+00> : vector<16x32xf32>
    %154 = tpu.matmul %153, %142, %cst_92 {dimension_numbers = #tpu.dot_dimension_numbers<[1], [0], [0], [1], [0, 0, 1, 1], [], []>} : vector<16x16xf32>, vector<16x32xf32>, vector<16x32xf32> -> vector<16x32xf32>
    %155 = arith.addf %124, %154 : vector<16x32xf32>
    %156 = vector.broadcast %26 : vector<1x32xf32> to vector<16x32xf32>
    %157 = arith.addf %155, %156 : vector<16x32xf32>
    %158 = arith.addf %157, %24 : vector<16x32xf32>
    %cst_93 = arith.constant dense<0.000000e+00> : vector<16xf32>
    %159 = vector.multi_reduction <add>, %158, %cst_93 [1] : vector<16x32xf32> to vector<16xf32>
    %160 = vector.shape_cast %159 : vector<16xf32> to vector<16x1xf32>
    %cst_94 = arith.constant 3.200000e+01 : f32
    %161 = vector.broadcast %cst_94 : f32 to vector<16x1xf32>
    %162 = arith.divf %160, %161 : vector<16x1xf32>
    %163 = vector.broadcast %162 : vector<16x1xf32> to vector<16x32xf32>
    %164 = arith.subf %158, %163 : vector<16x32xf32>
    %165 = arith.mulf %164, %164 : vector<16x32xf32>
    %cst_95 = arith.constant dense<0.000000e+00> : vector<16xf32>
    %166 = vector.multi_reduction <add>, %165, %cst_95 [1] : vector<16x32xf32> to vector<16xf32>
    %167 = vector.shape_cast %166 : vector<16xf32> to vector<16x1xf32>
    %cst_96 = arith.constant 3.200000e+01 : f32
    %168 = vector.broadcast %cst_96 : f32 to vector<16x1xf32>
    %169 = arith.divf %167, %168 : vector<16x1xf32>
    %170 = vector.broadcast %162 : vector<16x1xf32> to vector<16x32xf32>
    %171 = arith.subf %158, %170 : vector<16x32xf32>
    %cst_97 = arith.constant 9.99999997E-7 : f32
    %172 = vector.broadcast %cst_97 : f32 to vector<16x1xf32>
    %173 = arith.addf %169, %172 : vector<16x1xf32>
    %174 = math.rsqrt %173 : vector<16x1xf32>
    %175 = vector.broadcast %174 : vector<16x1xf32> to vector<16x32xf32>
    %176 = arith.mulf %171, %175 : vector<16x32xf32>
    %177 = vector.broadcast %27 : vector<1x32xf32> to vector<16x32xf32>
    %178 = arith.mulf %176, %177 : vector<16x32xf32>
    %179 = vector.broadcast %28 : vector<1x32xf32> to vector<16x32xf32>
    %180 = arith.addf %178, %179 : vector<16x32xf32>
    %c0_98 = arith.constant 0 : index
    %c32_99 = arith.constant 32 : index
    %c64_100 = arith.constant 64 : index
    %181 = vector.load %arg3[%c0_98, %c32_99, %c64_100] : memref<2x128x128xf32, #tpu.memory_space<vmem>>, vector<1x32x64xf32>
    %182 = vector.shape_cast %181 : vector<1x32x64xf32> to vector<32x64xf32>
    %c0_101 = arith.constant 0 : index
    %c64_102 = arith.constant 64 : index
    %c0_103 = arith.constant 0 : index
    %183 = vector.load %arg3[%c0_101, %c64_102, %c0_103] : memref<2x128x128xf32, #tpu.memory_space<vmem>>, vector<1x64x32xf32>
    %184 = vector.shape_cast %183 : vector<1x64x32xf32> to vector<64x32xf32>
    %cst_104 = arith.constant dense<0.000000e+00> : vector<16x64xf32>
    %185 = tpu.matmul %180, %182, %cst_104 {dimension_numbers = #tpu.dot_dimension_numbers<[1], [0], [0], [1], [0, 0, 1, 1], [], []>} : vector<16x32xf32>, vector<32x64xf32>, vector<16x64xf32> -> vector<16x64xf32>
    %186 = vector.broadcast %29 : vector<1x64xf32> to vector<16x64xf32>
    %187 = arith.addf %185, %186 : vector<16x64xf32>
    %cst_105 = arith.constant 0.000000e+00 : f32
    %188 = vector.broadcast %cst_105 : f32 to vector<16x64xf32>
    %189 = arith.maximumf %187, %188 : vector<16x64xf32>
    %cst_106 = arith.constant dense<0.000000e+00> : vector<16x32xf32>
    %190 = tpu.matmul %189, %184, %cst_106 {dimension_numbers = #tpu.dot_dimension_numbers<[1], [0], [0], [1], [0, 0, 1, 1], [], []>} : vector<16x64xf32>, vector<64x32xf32>, vector<16x32xf32> -> vector<16x32xf32>
    %191 = vector.broadcast %30 : vector<1x32xf32> to vector<16x32xf32>
    %192 = arith.addf %190, %191 : vector<16x32xf32>
    %193 = arith.addf %192, %158 : vector<16x32xf32>
    %c13 = arith.constant 13 : index
    %c0_107 = arith.constant 0 : index
    %194 = vector.load %arg2[%c13, %c0_107] : memref<56x128xf32, #tpu.memory_space<vmem>>, vector<1x32xf32>
    %c14 = arith.constant 14 : index
    %c0_108 = arith.constant 0 : index
    %195 = vector.load %arg2[%c14, %c0_108] : memref<56x128xf32, #tpu.memory_space<vmem>>, vector<1x32xf32>
    %c15 = arith.constant 15 : index
    %c0_109 = arith.constant 0 : index
    %196 = vector.load %arg2[%c15, %c0_109] : memref<56x128xf32, #tpu.memory_space<vmem>>, vector<1x32xf32>
    %c16_110 = arith.constant 16 : index
    %c0_111 = arith.constant 0 : index
    %197 = vector.load %arg2[%c16_110, %c0_111] : memref<56x128xf32, #tpu.memory_space<vmem>>, vector<1x64xf32>
    %c17 = arith.constant 17 : index
    %c0_112 = arith.constant 0 : index
    %198 = vector.load %arg2[%c17, %c0_112] : memref<56x128xf32, #tpu.memory_space<vmem>>, vector<1x32xf32>
    %cst_113 = arith.constant 0.000000e+00 : f32
    %199 = vector.broadcast %cst_113 : f32 to vector<16x32xf32>
    %c1_114 = arith.constant 1 : index
    %c32_115 = arith.constant 32 : index
    %c0_116 = arith.constant 0 : index
    %200 = vector.load %arg3[%c1_114, %c32_115, %c0_116] : memref<2x128x128xf32, #tpu.memory_space<vmem>>, vector<1x32x8xf32>
    %201 = vector.shape_cast %200 : vector<1x32x8xf32> to vector<32x8xf32>
    %c1_117 = arith.constant 1 : index
    %c32_118 = arith.constant 32 : index
    %c32_119 = arith.constant 32 : index
    %202 = vector.load %arg3[%c1_117, %c32_118, %c32_119] : memref<2x128x128xf32, #tpu.memory_space<vmem>>, vector<1x32x8xf32>
    %203 = vector.shape_cast %202 : vector<1x32x8xf32> to vector<32x8xf32>
    %c1_120 = arith.constant 1 : index
    %c0_121 = arith.constant 0 : index
    %c0_122 = arith.constant 0 : index
    %204 = vector.load %arg3[%c1_120, %c0_121, %c0_122] : memref<2x128x128xf32, #tpu.memory_space<vmem>>, vector<1x32x32xf32>
    %205 = vector.shape_cast %204 : vector<1x32x32xf32> to vector<32x32xf32>
    %c10 = arith.constant 10 : index
    %c0_123 = arith.constant 0 : index
    %206 = vector.load %arg2[%c10, %c0_123] : memref<56x128xf32, #tpu.memory_space<vmem>>, vector<1x8xf32>
    %c11 = arith.constant 11 : index
    %c0_124 = arith.constant 0 : index
    %207 = vector.load %arg2[%c11, %c0_124] : memref<56x128xf32, #tpu.memory_space<vmem>>, vector<1x8xf32>
    %c12 = arith.constant 12 : index
    %c0_125 = arith.constant 0 : index
    %208 = vector.load %arg2[%c12, %c0_125] : memref<56x128xf32, #tpu.memory_space<vmem>>, vector<1x32xf32>
    %cst_126 = arith.constant dense<0.000000e+00> : vector<16x8xf32>
    %209 = tpu.matmul %193, %201, %cst_126 {dimension_numbers = #tpu.dot_dimension_numbers<[1], [0], [0], [1], [0, 0, 1, 1], [], []>} : vector<16x32xf32>, vector<32x8xf32>, vector<16x8xf32> -> vector<16x8xf32>
    %210 = vector.broadcast %206 : vector<1x8xf32> to vector<16x8xf32>
    %211 = arith.addf %209, %210 : vector<16x8xf32>
    %cst_127 = arith.constant dense<0.000000e+00> : vector<16x8xf32>
    %212 = tpu.matmul %193, %203, %cst_127 {dimension_numbers = #tpu.dot_dimension_numbers<[1], [0], [0], [1], [0, 0, 1, 1], [], []>} : vector<16x32xf32>, vector<32x8xf32>, vector<16x8xf32> -> vector<16x8xf32>
    %213 = vector.broadcast %207 : vector<1x8xf32> to vector<16x8xf32>
    %214 = arith.addf %212, %213 : vector<16x8xf32>
    %cst_128 = arith.constant dense<0.000000e+00> : vector<16x32xf32>
    %215 = tpu.matmul %193, %205, %cst_128 {dimension_numbers = #tpu.dot_dimension_numbers<[1], [0], [0], [1], [0, 0, 1, 1], [], []>} : vector<16x32xf32>, vector<32x32xf32>, vector<16x32xf32> -> vector<16x32xf32>
    %216 = vector.broadcast %208 : vector<1x32xf32> to vector<16x32xf32>
    %217 = arith.addf %215, %216 : vector<16x32xf32>
    %cst_129 = arith.constant dense<0.000000e+00> : vector<16x16xf32>
    %218 = tpu.matmul %211, %214, %cst_129 {dimension_numbers = #tpu.dot_dimension_numbers<[1], [1], [0], [0], [0, 0, 1, 0], [], []>} : vector<16x8xf32>, vector<16x8xf32>, vector<16x16xf32> -> vector<16x16xf32>
    %219 = arith.addf %218, %25 : vector<16x16xf32>
    %cst_130 = arith.constant dense<0xFF800000> : vector<16xf32>
    %220 = vector.multi_reduction <maximumf>, %219, %cst_130 [1] : vector<16x16xf32> to vector<16xf32>
    %221 = vector.shape_cast %220 : vector<16xf32> to vector<16x1xf32>
    %222 = vector.broadcast %221 : vector<16x1xf32> to vector<16x16xf32>
    %223 = arith.subf %219, %222 : vector<16x16xf32>
    %224 = math.exp %223 : vector<16x16xf32>
    %cst_131 = arith.constant dense<0.000000e+00> : vector<16xf32>
    %225 = vector.multi_reduction <add>, %224, %cst_131 [1] : vector<16x16xf32> to vector<16xf32>
    %226 = vector.shape_cast %225 : vector<16xf32> to vector<16x1xf32>
    %227 = vector.broadcast %226 : vector<16x1xf32> to vector<16x16xf32>
    %228 = arith.divf %224, %227 : vector<16x16xf32>
    %cst_132 = arith.constant dense<0.000000e+00> : vector<16x32xf32>
    %229 = tpu.matmul %228, %217, %cst_132 {dimension_numbers = #tpu.dot_dimension_numbers<[1], [0], [0], [1], [0, 0, 1, 1], [], []>} : vector<16x16xf32>, vector<16x32xf32>, vector<16x32xf32> -> vector<16x32xf32>
    %230 = arith.addf %199, %229 : vector<16x32xf32>
    %c1_133 = arith.constant 1 : index
    %c32_134 = arith.constant 32 : index
    %c8_135 = arith.constant 8 : index
    %231 = vector.load %arg3[%c1_133, %c32_134, %c8_135] : memref<2x128x128xf32, #tpu.memory_space<vmem>>, vector<1x32x8xf32>
    %232 = vector.shape_cast %231 : vector<1x32x8xf32> to vector<32x8xf32>
    %c1_136 = arith.constant 1 : index
    %c32_137 = arith.constant 32 : index
    %c40_138 = arith.constant 40 : index
    %233 = vector.load %arg3[%c1_136, %c32_137, %c40_138] : memref<2x128x128xf32, #tpu.memory_space<vmem>>, vector<1x32x8xf32>
    %234 = vector.shape_cast %233 : vector<1x32x8xf32> to vector<32x8xf32>
    %c1_139 = arith.constant 1 : index
    %c0_140 = arith.constant 0 : index
    %c32_141 = arith.constant 32 : index
    %235 = vector.load %arg3[%c1_139, %c0_140, %c32_141] : memref<2x128x128xf32, #tpu.memory_space<vmem>>, vector<1x32x32xf32>
    %236 = vector.shape_cast %235 : vector<1x32x32xf32> to vector<32x32xf32>
    %c10_142 = arith.constant 10 : index
    %c8_143 = arith.constant 8 : index
    %237 = vector.load %arg2[%c10_142, %c8_143] : memref<56x128xf32, #tpu.memory_space<vmem>>, vector<1x8xf32>
    %c11_144 = arith.constant 11 : index
    %c8_145 = arith.constant 8 : index
    %238 = vector.load %arg2[%c11_144, %c8_145] : memref<56x128xf32, #tpu.memory_space<vmem>>, vector<1x8xf32>
    %c12_146 = arith.constant 12 : index
    %c32_147 = arith.constant 32 : index
    %239 = vector.load %arg2[%c12_146, %c32_147] : memref<56x128xf32, #tpu.memory_space<vmem>>, vector<1x32xf32>
    %cst_148 = arith.constant dense<0.000000e+00> : vector<16x8xf32>
    %240 = tpu.matmul %193, %232, %cst_148 {dimension_numbers = #tpu.dot_dimension_numbers<[1], [0], [0], [1], [0, 0, 1, 1], [], []>} : vector<16x32xf32>, vector<32x8xf32>, vector<16x8xf32> -> vector<16x8xf32>
    %241 = vector.broadcast %237 : vector<1x8xf32> to vector<16x8xf32>
    %242 = arith.addf %240, %241 : vector<16x8xf32>
    %cst_149 = arith.constant dense<0.000000e+00> : vector<16x8xf32>
    %243 = tpu.matmul %193, %234, %cst_149 {dimension_numbers = #tpu.dot_dimension_numbers<[1], [0], [0], [1], [0, 0, 1, 1], [], []>} : vector<16x32xf32>, vector<32x8xf32>, vector<16x8xf32> -> vector<16x8xf32>
    %244 = vector.broadcast %238 : vector<1x8xf32> to vector<16x8xf32>
    %245 = arith.addf %243, %244 : vector<16x8xf32>
    %cst_150 = arith.constant dense<0.000000e+00> : vector<16x32xf32>
    %246 = tpu.matmul %193, %236, %cst_150 {dimension_numbers = #tpu.dot_dimension_numbers<[1], [0], [0], [1], [0, 0, 1, 1], [], []>} : vector<16x32xf32>, vector<32x32xf32>, vector<16x32xf32> -> vector<16x32xf32>
    %247 = vector.broadcast %239 : vector<1x32xf32> to vector<16x32xf32>
    %248 = arith.addf %246, %247 : vector<16x32xf32>
    %cst_151 = arith.constant dense<0.000000e+00> : vector<16x16xf32>
    %249 = tpu.matmul %242, %245, %cst_151 {dimension_numbers = #tpu.dot_dimension_numbers<[1], [1], [0], [0], [0, 0, 1, 0], [], []>} : vector<16x8xf32>, vector<16x8xf32>, vector<16x16xf32> -> vector<16x16xf32>
    %250 = arith.addf %249, %25 : vector<16x16xf32>
    %cst_152 = arith.constant dense<0xFF800000> : vector<16xf32>
    %251 = vector.multi_reduction <maximumf>, %250, %cst_152 [1] : vector<16x16xf32> to vector<16xf32>
    %252 = vector.shape_cast %251 : vector<16xf32> to vector<16x1xf32>
    %253 = vector.broadcast %252 : vector<16x1xf32> to vector<16x16xf32>
    %254 = arith.subf %250, %253 : vector<16x16xf32>
    %255 = math.exp %254 : vector<16x16xf32>
    %cst_153 = arith.constant dense<0.000000e+00> : vector<16xf32>
    %256 = vector.multi_reduction <add>, %255, %cst_153 [1] : vector<16x16xf32> to vector<16xf32>
    %257 = vector.shape_cast %256 : vector<16xf32> to vector<16x1xf32>
    %258 = vector.broadcast %257 : vector<16x1xf32> to vector<16x16xf32>
    %259 = arith.divf %255, %258 : vector<16x16xf32>
    %cst_154 = arith.constant dense<0.000000e+00> : vector<16x32xf32>
    %260 = tpu.matmul %259, %248, %cst_154 {dimension_numbers = #tpu.dot_dimension_numbers<[1], [0], [0], [1], [0, 0, 1, 1], [], []>} : vector<16x16xf32>, vector<16x32xf32>, vector<16x32xf32> -> vector<16x32xf32>
    %261 = arith.addf %230, %260 : vector<16x32xf32>
    %c1_155 = arith.constant 1 : index
    %c32_156 = arith.constant 32 : index
    %c16_157 = arith.constant 16 : index
    %262 = vector.load %arg3[%c1_155, %c32_156, %c16_157] : memref<2x128x128xf32, #tpu.memory_space<vmem>>, vector<1x32x8xf32>
    %263 = vector.shape_cast %262 : vector<1x32x8xf32> to vector<32x8xf32>
    %c1_158 = arith.constant 1 : index
    %c32_159 = arith.constant 32 : index
    %c48_160 = arith.constant 48 : index
    %264 = vector.load %arg3[%c1_158, %c32_159, %c48_160] : memref<2x128x128xf32, #tpu.memory_space<vmem>>, vector<1x32x8xf32>
    %265 = vector.shape_cast %264 : vector<1x32x8xf32> to vector<32x8xf32>
    %c1_161 = arith.constant 1 : index
    %c0_162 = arith.constant 0 : index
    %c64_163 = arith.constant 64 : index
    %266 = vector.load %arg3[%c1_161, %c0_162, %c64_163] : memref<2x128x128xf32, #tpu.memory_space<vmem>>, vector<1x32x32xf32>
    %267 = vector.shape_cast %266 : vector<1x32x32xf32> to vector<32x32xf32>
    %c10_164 = arith.constant 10 : index
    %c16_165 = arith.constant 16 : index
    %268 = vector.load %arg2[%c10_164, %c16_165] : memref<56x128xf32, #tpu.memory_space<vmem>>, vector<1x8xf32>
    %c11_166 = arith.constant 11 : index
    %c16_167 = arith.constant 16 : index
    %269 = vector.load %arg2[%c11_166, %c16_167] : memref<56x128xf32, #tpu.memory_space<vmem>>, vector<1x8xf32>
    %c12_168 = arith.constant 12 : index
    %c64_169 = arith.constant 64 : index
    %270 = vector.load %arg2[%c12_168, %c64_169] : memref<56x128xf32, #tpu.memory_space<vmem>>, vector<1x32xf32>
    %cst_170 = arith.constant dense<0.000000e+00> : vector<16x8xf32>
    %271 = tpu.matmul %193, %263, %cst_170 {dimension_numbers = #tpu.dot_dimension_numbers<[1], [0], [0], [1], [0, 0, 1, 1], [], []>} : vector<16x32xf32>, vector<32x8xf32>, vector<16x8xf32> -> vector<16x8xf32>
    %272 = vector.broadcast %268 : vector<1x8xf32> to vector<16x8xf32>
    %273 = arith.addf %271, %272 : vector<16x8xf32>
    %cst_171 = arith.constant dense<0.000000e+00> : vector<16x8xf32>
    %274 = tpu.matmul %193, %265, %cst_171 {dimension_numbers = #tpu.dot_dimension_numbers<[1], [0], [0], [1], [0, 0, 1, 1], [], []>} : vector<16x32xf32>, vector<32x8xf32>, vector<16x8xf32> -> vector<16x8xf32>
    %275 = vector.broadcast %269 : vector<1x8xf32> to vector<16x8xf32>
    %276 = arith.addf %274, %275 : vector<16x8xf32>
    %cst_172 = arith.constant dense<0.000000e+00> : vector<16x32xf32>
    %277 = tpu.matmul %193, %267, %cst_172 {dimension_numbers = #tpu.dot_dimension_numbers<[1], [0], [0], [1], [0, 0, 1, 1], [], []>} : vector<16x32xf32>, vector<32x32xf32>, vector<16x32xf32> -> vector<16x32xf32>
    %278 = vector.broadcast %270 : vector<1x32xf32> to vector<16x32xf32>
    %279 = arith.addf %277, %278 : vector<16x32xf32>
    %cst_173 = arith.constant dense<0.000000e+00> : vector<16x16xf32>
    %280 = tpu.matmul %273, %276, %cst_173 {dimension_numbers = #tpu.dot_dimension_numbers<[1], [1], [0], [0], [0, 0, 1, 0], [], []>} : vector<16x8xf32>, vector<16x8xf32>, vector<16x16xf32> -> vector<16x16xf32>
    %281 = arith.addf %280, %25 : vector<16x16xf32>
    %cst_174 = arith.constant dense<0xFF800000> : vector<16xf32>
    %282 = vector.multi_reduction <maximumf>, %281, %cst_174 [1] : vector<16x16xf32> to vector<16xf32>
    %283 = vector.shape_cast %282 : vector<16xf32> to vector<16x1xf32>
    %284 = vector.broadcast %283 : vector<16x1xf32> to vector<16x16xf32>
    %285 = arith.subf %281, %284 : vector<16x16xf32>
    %286 = math.exp %285 : vector<16x16xf32>
    %cst_175 = arith.constant dense<0.000000e+00> : vector<16xf32>
    %287 = vector.multi_reduction <add>, %286, %cst_175 [1] : vector<16x16xf32> to vector<16xf32>
    %288 = vector.shape_cast %287 : vector<16xf32> to vector<16x1xf32>
    %289 = vector.broadcast %288 : vector<16x1xf32> to vector<16x16xf32>
    %290 = arith.divf %286, %289 : vector<16x16xf32>
    %cst_176 = arith.constant dense<0.000000e+00> : vector<16x32xf32>
    %291 = tpu.matmul %290, %279, %cst_176 {dimension_numbers = #tpu.dot_dimension_numbers<[1], [0], [0], [1], [0, 0, 1, 1], [], []>} : vector<16x16xf32>, vector<16x32xf32>, vector<16x32xf32> -> vector<16x32xf32>
    %292 = arith.addf %261, %291 : vector<16x32xf32>
    %c1_177 = arith.constant 1 : index
    %c32_178 = arith.constant 32 : index
    %c24_179 = arith.constant 24 : index
    %293 = vector.load %arg3[%c1_177, %c32_178, %c24_179] : memref<2x128x128xf32, #tpu.memory_space<vmem>>, vector<1x32x8xf32>
    %294 = vector.shape_cast %293 : vector<1x32x8xf32> to vector<32x8xf32>
    %c1_180 = arith.constant 1 : index
    %c32_181 = arith.constant 32 : index
    %c56_182 = arith.constant 56 : index
    %295 = vector.load %arg3[%c1_180, %c32_181, %c56_182] : memref<2x128x128xf32, #tpu.memory_space<vmem>>, vector<1x32x8xf32>
    %296 = vector.shape_cast %295 : vector<1x32x8xf32> to vector<32x8xf32>
    %c1_183 = arith.constant 1 : index
    %c0_184 = arith.constant 0 : index
    %c96_185 = arith.constant 96 : index
    %297 = vector.load %arg3[%c1_183, %c0_184, %c96_185] : memref<2x128x128xf32, #tpu.memory_space<vmem>>, vector<1x32x32xf32>
    %298 = vector.shape_cast %297 : vector<1x32x32xf32> to vector<32x32xf32>
    %c10_186 = arith.constant 10 : index
    %c24_187 = arith.constant 24 : index
    %299 = vector.load %arg2[%c10_186, %c24_187] : memref<56x128xf32, #tpu.memory_space<vmem>>, vector<1x8xf32>
    %c11_188 = arith.constant 11 : index
    %c24_189 = arith.constant 24 : index
    %300 = vector.load %arg2[%c11_188, %c24_189] : memref<56x128xf32, #tpu.memory_space<vmem>>, vector<1x8xf32>
    %c12_190 = arith.constant 12 : index
    %c96_191 = arith.constant 96 : index
    %301 = vector.load %arg2[%c12_190, %c96_191] : memref<56x128xf32, #tpu.memory_space<vmem>>, vector<1x32xf32>
    %cst_192 = arith.constant dense<0.000000e+00> : vector<16x8xf32>
    %302 = tpu.matmul %193, %294, %cst_192 {dimension_numbers = #tpu.dot_dimension_numbers<[1], [0], [0], [1], [0, 0, 1, 1], [], []>} : vector<16x32xf32>, vector<32x8xf32>, vector<16x8xf32> -> vector<16x8xf32>
    %303 = vector.broadcast %299 : vector<1x8xf32> to vector<16x8xf32>
    %304 = arith.addf %302, %303 : vector<16x8xf32>
    %cst_193 = arith.constant dense<0.000000e+00> : vector<16x8xf32>
    %305 = tpu.matmul %193, %296, %cst_193 {dimension_numbers = #tpu.dot_dimension_numbers<[1], [0], [0], [1], [0, 0, 1, 1], [], []>} : vector<16x32xf32>, vector<32x8xf32>, vector<16x8xf32> -> vector<16x8xf32>
    %306 = vector.broadcast %300 : vector<1x8xf32> to vector<16x8xf32>
    %307 = arith.addf %305, %306 : vector<16x8xf32>
    %cst_194 = arith.constant dense<0.000000e+00> : vector<16x32xf32>
    %308 = tpu.matmul %193, %298, %cst_194 {dimension_numbers = #tpu.dot_dimension_numbers<[1], [0], [0], [1], [0, 0, 1, 1], [], []>} : vector<16x32xf32>, vector<32x32xf32>, vector<16x32xf32> -> vector<16x32xf32>
    %309 = vector.broadcast %301 : vector<1x32xf32> to vector<16x32xf32>
    %310 = arith.addf %308, %309 : vector<16x32xf32>
    %cst_195 = arith.constant dense<0.000000e+00> : vector<16x16xf32>
    %311 = tpu.matmul %304, %307, %cst_195 {dimension_numbers = #tpu.dot_dimension_numbers<[1], [1], [0], [0], [0, 0, 1, 0], [], []>} : vector<16x8xf32>, vector<16x8xf32>, vector<16x16xf32> -> vector<16x16xf32>
    %312 = arith.addf %311, %25 : vector<16x16xf32>
    %cst_196 = arith.constant dense<0xFF800000> : vector<16xf32>
    %313 = vector.multi_reduction <maximumf>, %312, %cst_196 [1] : vector<16x16xf32> to vector<16xf32>
    %314 = vector.shape_cast %313 : vector<16xf32> to vector<16x1xf32>
    %315 = vector.broadcast %314 : vector<16x1xf32> to vector<16x16xf32>
    %316 = arith.subf %312, %315 : vector<16x16xf32>
    %317 = math.exp %316 : vector<16x16xf32>
    %cst_197 = arith.constant dense<0.000000e+00> : vector<16xf32>
    %318 = vector.multi_reduction <add>, %317, %cst_197 [1] : vector<16x16xf32> to vector<16xf32>
    %319 = vector.shape_cast %318 : vector<16xf32> to vector<16x1xf32>
    %320 = vector.broadcast %319 : vector<16x1xf32> to vector<16x16xf32>
    %321 = arith.divf %317, %320 : vector<16x16xf32>
    %cst_198 = arith.constant dense<0.000000e+00> : vector<16x32xf32>
    %322 = tpu.matmul %321, %310, %cst_198 {dimension_numbers = #tpu.dot_dimension_numbers<[1], [0], [0], [1], [0, 0, 1, 1], [], []>} : vector<16x16xf32>, vector<16x32xf32>, vector<16x32xf32> -> vector<16x32xf32>
    %323 = arith.addf %292, %322 : vector<16x32xf32>
    %324 = vector.broadcast %194 : vector<1x32xf32> to vector<16x32xf32>
    %325 = arith.addf %323, %324 : vector<16x32xf32>
    %326 = arith.addf %325, %193 : vector<16x32xf32>
    %cst_199 = arith.constant dense<0.000000e+00> : vector<16xf32>
    %327 = vector.multi_reduction <add>, %326, %cst_199 [1] : vector<16x32xf32> to vector<16xf32>
    %328 = vector.shape_cast %327 : vector<16xf32> to vector<16x1xf32>
    %cst_200 = arith.constant 3.200000e+01 : f32
    %329 = vector.broadcast %cst_200 : f32 to vector<16x1xf32>
    %330 = arith.divf %328, %329 : vector<16x1xf32>
    %331 = vector.broadcast %330 : vector<16x1xf32> to vector<16x32xf32>
    %332 = arith.subf %326, %331 : vector<16x32xf32>
    %333 = arith.mulf %332, %332 : vector<16x32xf32>
    %cst_201 = arith.constant dense<0.000000e+00> : vector<16xf32>
    %334 = vector.multi_reduction <add>, %333, %cst_201 [1] : vector<16x32xf32> to vector<16xf32>
    %335 = vector.shape_cast %334 : vector<16xf32> to vector<16x1xf32>
    %cst_202 = arith.constant 3.200000e+01 : f32
    %336 = vector.broadcast %cst_202 : f32 to vector<16x1xf32>
    %337 = arith.divf %335, %336 : vector<16x1xf32>
    %338 = vector.broadcast %330 : vector<16x1xf32> to vector<16x32xf32>
    %339 = arith.subf %326, %338 : vector<16x32xf32>
    %cst_203 = arith.constant 9.99999997E-7 : f32
    %340 = vector.broadcast %cst_203 : f32 to vector<16x1xf32>
    %341 = arith.addf %337, %340 : vector<16x1xf32>
    %342 = math.rsqrt %341 : vector<16x1xf32>
    %343 = vector.broadcast %342 : vector<16x1xf32> to vector<16x32xf32>
    %344 = arith.mulf %339, %343 : vector<16x32xf32>
    %345 = vector.broadcast %195 : vector<1x32xf32> to vector<16x32xf32>
    %346 = arith.mulf %344, %345 : vector<16x32xf32>
    %347 = vector.broadcast %196 : vector<1x32xf32> to vector<16x32xf32>
    %348 = arith.addf %346, %347 : vector<16x32xf32>
    %c1_204 = arith.constant 1 : index
    %c32_205 = arith.constant 32 : index
    %c64_206 = arith.constant 64 : index
    %349 = vector.load %arg3[%c1_204, %c32_205, %c64_206] : memref<2x128x128xf32, #tpu.memory_space<vmem>>, vector<1x32x64xf32>
    %350 = vector.shape_cast %349 : vector<1x32x64xf32> to vector<32x64xf32>
    %c1_207 = arith.constant 1 : index
    %c64_208 = arith.constant 64 : index
    %c0_209 = arith.constant 0 : index
    %351 = vector.load %arg3[%c1_207, %c64_208, %c0_209] : memref<2x128x128xf32, #tpu.memory_space<vmem>>, vector<1x64x32xf32>
    %352 = vector.shape_cast %351 : vector<1x64x32xf32> to vector<64x32xf32>
    %cst_210 = arith.constant dense<0.000000e+00> : vector<16x64xf32>
    %353 = tpu.matmul %348, %350, %cst_210 {dimension_numbers = #tpu.dot_dimension_numbers<[1], [0], [0], [1], [0, 0, 1, 1], [], []>} : vector<16x32xf32>, vector<32x64xf32>, vector<16x64xf32> -> vector<16x64xf32>
    %354 = vector.broadcast %197 : vector<1x64xf32> to vector<16x64xf32>
    %355 = arith.addf %353, %354 : vector<16x64xf32>
    %cst_211 = arith.constant 0.000000e+00 : f32
    %356 = vector.broadcast %cst_211 : f32 to vector<16x64xf32>
    %357 = arith.maximumf %355, %356 : vector<16x64xf32>
    %cst_212 = arith.constant dense<0.000000e+00> : vector<16x32xf32>
    %358 = tpu.matmul %357, %352, %cst_212 {dimension_numbers = #tpu.dot_dimension_numbers<[1], [0], [0], [1], [0, 0, 1, 1], [], []>} : vector<16x64xf32>, vector<64x32xf32>, vector<16x32xf32> -> vector<16x32xf32>
    %359 = vector.broadcast %198 : vector<1x32xf32> to vector<16x32xf32>
    %360 = arith.addf %358, %359 : vector<16x32xf32>
    %361 = arith.addf %360, %326 : vector<16x32xf32>
    %c24_213 = arith.constant 24 : index
    %c0_214 = arith.constant 0 : index
    %362 = vector.load %arg2[%c24_213, %c0_214] : memref<56x128xf32, #tpu.memory_space<vmem>>, vector<32x128xf32>
    %c18 = arith.constant 18 : index
    %c0_215 = arith.constant 0 : index
    %363 = vector.load %arg2[%c18, %c0_215] : memref<56x128xf32, #tpu.memory_space<vmem>>, vector<1x128xf32>
    %cst_216 = arith.constant dense<0.000000e+00> : vector<16x128xf32>
    %364 = tpu.matmul %361, %362, %cst_216 {dimension_numbers = #tpu.dot_dimension_numbers<[1], [0], [0], [1], [0, 0, 1, 1], [], []>} : vector<16x32xf32>, vector<32x128xf32>, vector<16x128xf32> -> vector<16x128xf32>
    %365 = vector.broadcast %363 : vector<1x128xf32> to vector<16x128xf32>
    %366 = arith.addf %364, %365 : vector<16x128xf32>
    %c0_217 = arith.constant 0 : index
    %c0_218 = arith.constant 0 : index
    %367 = vector.load %arg4[%c0_217, %c0_218] : memref<16x128xf32, #tpu.memory_space<vmem>>, vector<16x128xf32>
    tpu.vector_store %arg4[%c0_217, %c0_218], %366 {strides = array<i32>} : memref<16x128xf32, #tpu.memory_space<vmem>>, vector<16x128xf32>,
    return
  }
}

</mosaic_0001>

<bundles_post_ra>
// kernel: tpu_custom_call.1
= control target key start
LH: loop header
LB: loop body
LE: loop exit
PB: predicated region body
PF: predicated region fallthrough
CT: control target
= control target key end

     0   :  { %9 = vsyncpa [#allocation3], 0  ;;  %s6642_s0 = inlined_call_operand.hbm [shape: f32[16,32], index: 0, kind: input, shape index: {}]   ;;  %s6643_s1 = inlined_call_operand.hbm [shape: f32[16,16], index: 1, kind: input, shape index: {}]   ;;  %s6644_s2 = inlined_call_operand.hbm [shape: f32[56,128], index: 2, kind: input, shape index: {}]   ;;  %s6645_s3 = inlined_call_operand.hbm [shape: f32[2,128,128], index: 3, kind: input, shape index: {}]   ;;  %s6646_s4 = inlined_call_operand.hbm [shape: f32[16,128], index: 4, kind: output, shape index: {}]  }
   0x1   :  { %10 = vsyncpa [#allocation6], 0 }
   0x2   :  { %11 = vsyncpa [#allocation9], 0 }
   0x3   :  { %12 = vsyncpa [#allocation4], 0  ;;  %s6016_s15 = smov [#allocation5]   ;;  %s6017_s17 = smov [#allocation2]  }
   0x4   :  { %s30_s16 = sshll.u32 %s6016_s15, 4  ;;  %s18_s18 = sshll.u32 %s6017_s17, 4  ;;  %s31_s16 = int_to_ptr.vmem [resolvable:$true] %s30_s16  ;;  %s6057_s18 = int_to_ptr.vmem [resolvable:$true] %s18_s18 }
   0x5   :  { %s5898_s21 = scalar_lea.hbm %s6643_s1, 256 }
   0x6   :  { %p5899_p0 = scmp.ne.s32.totalorder %s6643_s1, %s5898_s21  ;;  %p5902_p1 = scmp.lt.u32.totalorder %s5898_s21, %s6643_s1 }
   0x8   :  { %p5904_p2 = pnand %p5902_p1, %p5899_p0 }
   0xa   :  { %5907 = shalt.err (!%p5904_p2)
}
   0xb   :  { %s5908_s26 = scalar_lea.vmem %s31_s16, 256  ;;  %p5913_p4 = scmp.lt.s32.totalorder %s31_s16, %s31_s16 }
   0xc   :  { %p5909_p3 = scmp.ne.s32.totalorder %s31_s16, %s5908_s26  ;;  %p5914_p5 = scmp.lt.s32.totalorder %s5908_s26, %s5908_s26 }
   0xe   :  { %p5915_p6 = por %p5914_p5, %p5913_p4 }
  0x10   :  { %p5916_p7 = pnand %p5915_p6, %p5909_p3 }
  0x12   :  { %5919 = shalt.err (!%p5916_p7)
}
  0x13   :  { %s6018_s27 = smov 128   ;;  %s6019_s28 = smov 8  }
  0x14   :  { %36 = dma.hbm_to_vmem [thread:$0]  %s6643_s1, 256, %s31_s16, [#allocation6], %s6018_s27, %s6018_s27, %s6019_s28  }
  0x15   :  { %s5920_s7 = scalar_lea.hbm %s6642_s0, 256 }
  0x16   :  { %p5921_p8 = scmp.ne.s32.totalorder %s6642_s0, %s5920_s7  ;;  %p5924_p9 = scmp.lt.u32.totalorder %s5920_s7, %s6642_s0 }
  0x18   :  { %p5926_p10 = pnand %p5924_p9, %p5921_p8 }
  0x1a   :  { %5929 = shalt.err (!%p5926_p10)
}
  0x1b   :  { %s5930_s12 = scalar_lea.vmem %s6057_s18, 256  ;;  %p5935_p12 = scmp.lt.s32.totalorder %s6057_s18, %s6057_s18 }
  0x1c   :  { %p5931_p11 = scmp.ne.s32.totalorder %s6057_s18, %s5930_s12  ;;  %p5936_p13 = scmp.lt.s32.totalorder %s5930_s12, %s5930_s12 }
  0x1e   :  { %p5937_p0 = por %p5936_p13, %p5935_p12 }
  0x20   :  { %p5938_p1 = pnand %p5937_p0, %p5931_p11 }
  0x22   :  { %5941 = shalt.err (!%p5938_p1)
}
  0x23   :  { %24 = dma.hbm_to_vmem [thread:$0]  %s6642_s0, 256, %s6057_s18, [#allocation3], %s6018_s27, %s6018_s27, %s6019_s28  }
  0x24   :  { %s6020_s14 = smov [#allocation7]   ;;  %s6021_s16 = smov [#allocation8]  }
  0x25   :  { %s42_s15 = sshll.u32 %s6020_s14, 4  ;;  %s54_s17 = sshll.u32 %s6021_s16, 4  ;;  %s43_s15 = int_to_ptr.vmem [resolvable:$true] %s42_s15  ;;  %s6094_s17 = int_to_ptr.vmem [resolvable:$true] %s54_s17 }
  0x26   :  { %s5942_s21 = scalar_lea.hbm %s6644_s2, 896 }
  0x27   :  { %p5943_p2 = scmp.ne.s32.totalorder %s6644_s2, %s5942_s21  ;;  %p5946_p3 = scmp.lt.u32.totalorder %s5942_s21, %s6644_s2 }
  0x29   :  { %p5948_p4 = pnand %p5946_p3, %p5943_p2 }
  0x2b   :  { %5951 = shalt.err (!%p5948_p4)
}
  0x2c   :  { %s5952_s0 = scalar_lea.vmem %s43_s15, 896  ;;  %p5957_p6 = scmp.lt.s32.totalorder %s43_s15, %s43_s15 }
  0x2d   :  { %p5953_p5 = scmp.ne.s32.totalorder %s43_s15, %s5952_s0  ;;  %p5958_p7 = scmp.lt.s32.totalorder %s5952_s0, %s5952_s0 }
  0x2f   :  { %p5959_p8 = por %p5958_p7, %p5957_p6 }
  0x31   :  { %p5960_p9 = pnand %p5959_p8, %p5953_p5 }
  0x33   :  { %5963 = shalt.err (!%p5960_p9)
}
  0x34   :  { %48 = dma.hbm_to_vmem [thread:$0]  %s6644_s2, 896, %s43_s15, [#allocation6], %s6018_s27, %s6018_s27, %s6019_s28  }
  0x35   :  { %s5964_s5 = scalar_lea.hbm %s6645_s3, 4096 }
  0x36   :  { %p5965_p10 = scmp.ne.s32.totalorder %s6645_s3, %s5964_s5  ;;  %p5968_p11 = scmp.lt.u32.totalorder %s5964_s5, %s6645_s3 }
  0x38   :  { %p5970_p12 = pnand %p5968_p11, %p5965_p10 }
  0x3a   :  { %5973 = shalt.err (!%p5970_p12)
}
  0x3b   :  { %s5974_s10 = scalar_lea.vmem %s6094_s17, 4096  ;;  %p5979_p0 = scmp.lt.s32.totalorder %s6094_s17, %s6094_s17 }
  0x3c   :  { %p5975_p13 = scmp.ne.s32.totalorder %s6094_s17, %s5974_s10  ;;  %p5980_p1 = scmp.lt.s32.totalorder %s5974_s10, %s5974_s10 }
  0x3e   :  { %p5981_p2 = por %p5980_p1, %p5979_p0 }
  0x40   :  { %p5982_p3 = pnand %p5981_p2, %p5975_p13 }
  0x42   :  { %5985 = shalt.err (!%p5982_p3)
}
  0x43   :  { %60 = dma.hbm_to_vmem [thread:$0]  %s6645_s3, 4096, %s6094_s17, [#allocation9], %s6018_s27, %s6018_s27, %s6019_s28  }
  0x44   :  { %6008 = dma.done.wait [#allocation3], 256  }
  0x45   :  { %6009 = vsyncadd [#allocation3], 4294967040 }
  0x46   :  { %6010 = dma.done.wait [#allocation6], 1152  }
  0x47   :  { %6011 = vsyncadd [#allocation6], 4294966144 }
  0x48   :  { %6012 = dma.done.wait [#allocation9], 4096  }
  0x49   :  { %6013 = vsyncadd [#allocation9], 4294963200  ;;  %vm77_vm0 = vcmask 261120   ;;  %v73_v0 = vld [vmem:[#allocation2] sm:$0xff]  ;;  %v74_v1 = vld [vmem:[#allocation2 + $0x8] sm:$0xff]  ;;  %s6022_s3 = smov 96  }
  0x4a   :  { %v78_v2 = vsel %vm77_vm0, %v73_v0, 0.0  ;;  %v81_v3 = vsel %vm77_vm0, %v74_v1, 0.0  ;;  %v124_v4 = vld [vmem:[#allocation8 + $0x20] sm:$0xff]  ;;  %v125_v5 = vld [vmem:[#allocation8 + $0x28] sm:$0xff]  ;;  %s6023_s12 = smov 120   ;;  %v126_v21 = vld [vmem:[#allocation8 + $0x30] sm:$0xff] }
  0x4b   :  { %79 = vadd.xlane.f32.xlu0 %v78_v2  ;;  %v6133_v6 = vpack.i.bf16 %v125_v5, %v124_v4  ;;  %v6139_v7 = vld [vmem:[#allocation7 + $0x3] ss:$0 sm:$0xff]  ;;  %v128_v8 = vld [vmem:[#allocation8] sm:$0xff]  ;;  %v127_v22 = vld [vmem:[#allocation8 + $0x38] sm:$0xff]  ;;  %s6024_s1 = smov 88   ;;  %v5244_v27 = vpack.c.bf16 %v125_v5, %v124_v4  ;;  %vm394_vm1 = vcmask 64512  }
  0x4c   :  { %v129_v9 = vld [vmem:[#allocation8 + $0x8] sm:$0xff]  ;;  %v6149_v23 = vpack.i.bf16 %v127_v22, %v126_v21  ;;  %v5248_v29 = vpack.c.bf16 %v127_v22, %v126_v21  ;;  %v130_v31 = vld [vmem:[#allocation8 + $0x10] sm:$0xff]  ;;  %v131_v32 = vld [vmem:[#allocation8 + $0x18] sm:$0xff]  ;;  %vm482_vm3 = vcmask 130048   ;;  %s6025_s13 = smov 80   ;;  %s6026_s14 = smov 112  }
  0x4d   :  { %v6143_v10 = vpack.i.bf16 %v129_v9, %v128_v8  ;;  %5245 = vmatprep.subr.bf16.mxu0 %v5244_v27  ;;  %v6159_v30 = vld [vmem:[#allocation7 + $0x2] ss:$0 sm:$0xff]  ;;  %v5260_v33 = vpack.c.bf16 %v129_v9, %v128_v8  ;;  %v6163_v34 = vpack.i.bf16 %v131_v32, %v130_v31  ;;  %v4426_v47 = vld [vmem:[#allocation7] ss:$0 sm:$0xff]  ;;  %v4427_v50 = vld [vmem:[#allocation7 + $0x1] ss:$0 sm:$0xff]  ;;  %v5264_v62 = vpack.c.bf16 %v131_v32, %v130_v31 }
  0x4e   :  { %5247 = vmatpush3.bf16.msra.mxu0 %v5244_v27  ;;  %vm6206_vm2 = vmpackc.low %vm394_vm1, %vm394_vm1  ;;  %s6027_s15 = smov 64   ;;  %s6028_s16 = smov 104   ;;  %vm2134_vm4 = vcmask 523264  }
  0x4f   :  { %82 = vadd.xlane.f32.xlu0 %v81_v3  ;;  %5249 = vmatprep.subr.bf16.mxu0 %v5248_v29  ;;  %s6029_s17 = smov 72   ;;  %s6030_s19 = smov 32  }
  0x50   :  { %s6031_s20 = smov [#allocation10]  }
  0x51   :  { %s4412_s21 = sshll.u32 %s6031_s20, 4  ;;  %s4413_s21 = int_to_ptr.vmem [resolvable:$true] %s4412_s21 }
  0x52   :  { %5251 = vmatpush3.bf16.msra.mxu0 %v5248_v29  ;;  %s5986_s22 = scalar_lea.vmem %s4413_s21, 256  ;;  %p5991_p5 = scmp.lt.s32.totalorder %s4413_s21, %s4413_s21 }
  0x53   :  { %5261 = vmatprep.subr.bf16.mxu0 %v5260_v33  ;;  %p5987_p4 = scmp.ne.s32.totalorder %s4413_s21, %s5986_s22  ;;  %p5992_p6 = scmp.lt.s32.totalorder %s5986_s22, %s5986_s22 }
  0x55   :  { %p5993_p7 = por %p5992_p6, %p5991_p5 }
  0x57   :  { %p5994_p8 = pnand %p5993_p7, %p5987_p4 }
  0x65   :  { %5601 = vrot.lane.b32.xlu0 %v6133_v6, %s6022_s3 }
  0x69   :  { %5621 = vrot.lane.b32.xlu0 %v6133_v6, %s6023_s12 }
  0x6d   :  { %609 = vrot.lane.b32.xlu0 %v6139_v7, %s6023_s12 }
  0x71   :  { %5631 = vrot.lane.b32.xlu0 %v6143_v10, %s6022_s3 }
  0xd8   :  { %v80_v11 = vpop.xlane.xlu0 %79 }
  0xd9   :  { %v85_v12 = vmul.f32 0.03125, %v80_v11 }
  0xdb   :  { %v87_v13 = vsub.f32 %v73_v0, %v85_v12 }
  0xdc   :  { %v83_v14 = vpop.xlane.xlu0 %82 }
  0xdd   :  { %v86_v15 = vmul.f32 0.03125, %v83_v14  ;;  %v89_v16 = vmul.f32 %v87_v13, %v87_v13 }
  0xdf   :  { %v88_v17 = vsub.f32 %v74_v1, %v86_v15  ;;  %v91_v18 = vsel %vm77_vm0, %v89_v16, 0.0 }
  0xe0   :  { %92 = vadd.xlane.f32.xlu1 %v91_v18  ;;  %v5602_v24 = vpop.permute.xlu0 %5601 }
  0xe1   :  { %v90_v19 = vmul.f32 %v88_v17, %v88_v17  ;;  %v5604_v25 = vunpack.i.h.bf16 %v5602_v24  ;;  %v5603_v26 = vunpack.i.l.bf16 %v5602_v24 }
  0xe3   :  { %v94_v20 = vsel %vm77_vm0, %v90_v19, 0.0  ;;  %v5252_v28 = vpack.c.bf16 %v5604_v25, %v5603_v26 }
  0xe4   :  { %95 = vadd.xlane.f32.xlu1 %v94_v20  ;;  %v5622_v51 = vpop.permute.xlu0 %5621 }
  0xe5   :  { %5253 = vmatprep.subr.bf16.mxu1 %v5252_v28  ;;  %v5624_v60 = vunpack.i.h.bf16 %v5622_v51  ;;  %v5623_v61 = vunpack.i.l.bf16 %v5622_v51 }
  0xe6   :  { %5255 = vmatpush3.bf16.msra.mxu1 %v5252_v28  ;;  %v6213_v28 = vld [vmem:[#allocation7 + $0x4] ss:$0 sm:$0xff] }
  0xe7   :  { %v5274_v2 = vpack.c.bf16 %v5624_v60, %v5623_v61 }
  0xe8   :  { %v6177_v58 = vpop.permute.xlu0 %609 }
  0xec   :  { %v5632_v3 = vpop.permute.xlu0 %5631 }
  0xed   :  { %v5634_v5 = vunpack.i.h.bf16 %v5632_v3  ;;  %v5633_v8 = vunpack.i.l.bf16 %v5632_v3 }
  0xf5   :  { %5606 = vrot.lane.b32.xlu1 %v6149_v23, %s6022_s3 }
  0xf9   :  { %5611 = vrot.lane.b32.xlu1 %v6133_v6, %s6024_s1 }
  0xfd   :  { %5616 = vrot.lane.b32.xlu1 %v6149_v23, %s6024_s1 }
 0x101   :  { %5626 = vrot.lane.b32.xlu1 %v6149_v23, %s6023_s12 }
 0x105   :  { %518 = vrot.lane.b32.xlu1 %v6159_v30, %s6023_s12 }
 0x109   :  { %5636 = vrot.lane.b32.xlu1 %v6163_v34, %s6022_s3 }
 0x16d   :  { %v93_v35 = vpop.xlane.xlu1 %92 }
 0x16e   :  { %v97_v36 = vmul.f32 0.03125, %v93_v35 }
 0x170   :  { %v99_v37 = vadd.f32 1e-05, %v97_v36 }
 0x171   :  { %v96_v38 = vpop.xlane.xlu1 %95 }
 0x172   :  { %5820 = vrsqrt.f32 %v99_v37  ;;  %v98_v39 = vmul.f32 0.03125, %v96_v38 }
 0x174   :  { %v100_v40 = vadd.f32 1e-05, %v98_v39 }
 0x175   :  { %v5607_v41 = vpop.permute.xlu1 %5606 }
 0x176   :  { %5822 = vrsqrt.f32 %v100_v40  ;;  %v5609_v42 = vunpack.i.h.bf16 %v5607_v41  ;;  %v5608_v43 = vunpack.i.l.bf16 %v5607_v41 }
 0x178   :  { %v5256_v44 = vpack.c.bf16 %v5609_v42, %v5608_v43 }
 0x179   :  { %v6167_v45 = vpop.permute.xlu1 %5611 }
 0x17a   :  { %5257 = vmatprep.subr.bf16.mxu1 %v5256_v44  ;;  %v5614_v15 = vunpack.i.h.bf16 %v6167_v45  ;;  %v5613_v16 = vunpack.i.l.bf16 %v6167_v45  ;;  %v6229_v45 = vld [vmem:[#allocation5 + $0x8] sm:$0xff] }
 0x17b   :  { %5259 = vmatpush3.bf16.msra.mxu1 %v5256_v44 }
 0x17c   :  { %v5821_v46 = vpop.eup %5820  ;;  %v5282_v26 = vpack.c.bf16 %v5614_v15, %v5613_v16 }
 0x17d   :  { %v103_v48 = vmul.f32 %v5821_v46, %v87_v13  ;;  %v6169_v49 = vpop.permute.xlu1 %5616  ;;  %v5290_v13 = vpack.c.bf16 %v5634_v5, %v5633_v8  ;;  %v6231_v46 = vld [vmem:[#allocation5] sm:$0xff] }
 0x17e   :  { %v5619_v29 = vunpack.i.h.bf16 %v6169_v49  ;;  %v5618_v31 = vunpack.i.l.bf16 %v6169_v49 }
 0x17f   :  { %v109_v52 = vmul.f32 %v4426_v47, %v103_v48 }
 0x180   :  { %v5823_v53 = vpop.eup %5822  ;;  %v5286_v37 = vpack.c.bf16 %v5619_v29, %v5618_v31 }
 0x181   :  { %v6171_v54 = vadd.f32 %v4427_v50, %v109_v52  ;;  %v104_v55 = vmul.f32 %v5823_v53, %v88_v17  ;;  %v5627_v56 = vpop.permute.xlu1 %5626 }
 0x182   :  { %v5629_v0 = vunpack.i.h.bf16 %v5627_v56  ;;  %v5628_v1 = vunpack.i.l.bf16 %v5627_v56 }
 0x183   :  { %v110_v57 = vmul.f32 %v4426_v47, %v104_v55  ;;  %4805 = vmatprep.mubr.msk.f32.mxu0 %vm77_vm0, %v6171_v54  ;;  %4816 = vmatprep.mubr.msk.f32.mxu1 %vm77_vm0, %v6171_v54 }
 0x184   :  { %v5278_v4 = vpack.c.bf16 %v5629_v0, %v5628_v1 }
 0x185   :  { %v6179_v59 = vadd.f32 %v4427_v50, %v110_v57  ;;  %v6187_v63 = vpop.permute.xlu1 %518 }
 0x187   :  { %4806 = vmatmul.mubr.msk.f32.vlgmr.msra.gmra.mrb[0].mxu0 %vm77_vm0, %v6179_v59  ;;  %4817 = vmatmul.mubr.msk.f32.vlgmr.msra.gmra.mrb[0].mxu1 %vm77_vm0, %v6179_v59 }
 0x188   :  { %5263 = vmatpush3.bf16.msra.mxu0 %v5260_v33  ;;  %4827 = vmatprep.mubr.msk.f32.mxu0 %vm77_vm0, %v6171_v54 }
 0x189   :  { %5265 = vmatprep.subr.bf16.mxu0 %v5264_v62  ;;  %v5637_v9 = vpop.permute.xlu1 %5636 }
 0x18a   :  { %v5639_v11 = vunpack.i.h.bf16 %v5637_v9  ;;  %v5638_v12 = vunpack.i.l.bf16 %v5637_v9 }
 0x18c   :  { %5267 = vmatpush3.bf16.msra.mxu0 %v5264_v62  ;;  %v5294_v14 = vpack.c.bf16 %v5639_v11, %v5638_v12 }
 0x18d   :  { %5275 = vmatprep.subr.bf16.mxu0 %v5274_v2 }
 0x18f   :  { %4828 = vmatmul.mubr.msk.f32.vlgmr.msra.gmra.mrb[2].mxu0 %vm77_vm0, %v6179_v59 }
 0x190   :  { %5277 = vmatpush3.bf16.msra.mxu0 %v5274_v2  ;;  %4845 = vmatprep.mubr.msk.f32.mxu0 %vm77_vm0, %v6171_v54 }
 0x191   :  { %5279 = vmatprep.subr.bf16.mxu0 %v5278_v4 }
 0x194   :  { %5281 = vmatpush3.bf16.msra.mxu0 %v5278_v4 }
 0x195   :  { %5291 = vmatprep.subr.bf16.mxu0 %v5290_v13 }
 0x197   :  { %4846 = vmatmul.mubr.msk.f32.vlgmr.msra.gmra.mrb[4].mxu0 %vm77_vm0, %v6179_v59 }
 0x198   :  { %5293 = vmatpush3.bf16.msra.mxu0 %v5290_v13  ;;  %4867 = vmatprep.mubr.msk.f32.mxu0 %vm77_vm0, %v6171_v54 }
 0x199   :  { %5295 = vmatprep.subr.bf16.mxu0 %v5294_v14 }
 0x19c   :  { %5297 = vmatpush3.bf16.msra.mxu0 %v5294_v14 }
 0x19f   :  { %4868 = vmatmul.mubr.msk.f32.vlgmr.msra.gmra.mrb[6].mxu0 %vm77_vm0, %v6179_v59 }
 0x25a   :  { %v4807_v17 = vpop.f32.mrb[0].mxu0  ;;  %v4818_v18 = vpop.f32.mrb[0].mxu1 }
 0x25b   :  { %v312_v19 = vadd.f32 %v4818_v18, %v6139_v7  ;;  %v211_v20 = vpop.f32.mrb[1].mxu0  ;;  %v306_v21 = vpop.f32.mrb[1].mxu1  ;;  %v217_v38 = vadd.f32 %v4807_v17, %v6159_v30 }
 0x25c   :  { %v212_v22 = vadd.f32 %v6159_v30, %v211_v20  ;;  %v307_v24 = vadd.f32 %v6139_v7, %v306_v21 }
 0x25e   :  { %v5268_v27 = vpack.c.bf16 %v312_v19, %v307_v24  ;;  %4834 = vmatprep.mubr.msk.f32.mxu1 %vm394_vm1, %v212_v22 }
 0x260   :  { %5270 = vmatprep.subr.msk.bf16.mxu1 %vm6206_vm2, %v5268_v27 }
 0x261   :  { %5273 = vmatpush3.bf16.xpose.msk.msra.mxu1 %vm6206_vm2, %v5268_v27 }
 0x262   :  { %v4829_v32 = vpop.f32.mrb[2].mxu0  ;;  %5283 = vmatprep.subr.bf16.mxu1 %v5282_v26 }
 0x263   :  { %v391_v33 = vadd.f32 %v4829_v32, %v6213_v28  ;;  %v385_v35 = vpop.f32.mrb[3].mxu0 }
 0x264   :  { %v386_v36 = vadd.f32 %v6213_v28, %v385_v35 }
 0x266   :  { %v5308_v39 = vpack.c.bf16 %v391_v33, %v386_v36 }
 0x268   :  { %5309 = vmatprep.subr.bf16.mxu0 %v5308_v39  ;;  %4835 = vmatmul.mubr.msk.f32.vlgmr.msra.gmra.mrb[2].mxu1 %vm394_vm1, %v217_v38 }
 0x269   :  { %5311 = vmatpush3.bf16.msra.mxu0 %v5308_v39  ;;  %5285 = vmatpush3.bf16.msra.mxu1 %v5282_v26 }
 0x26a   :  { %v4847_v40 = vpop.f32.mrb[4].mxu0  ;;  %4856 = vmatprep.mubr.msk.f32.mxu1 %vm77_vm0, %v6171_v54  ;;  %5287 = vmatprep.subr.bf16.mxu1 %v5286_v37 }
 0x26b   :  { %v587_v41 = vpop.f32.mrb[5].mxu0  ;;  %v593_v61 = vadd.f32 %v4847_v40, %v6187_v63 }
 0x26c   :  { %v588_v42 = vadd.f32 %v587_v41, %v6187_v63 }
 0x26d   :  { %5289 = vmatpush3.bf16.msra.mxu1 %v5286_v37 }
 0x270   :  { %4857 = vmatmul.mubr.msk.f32.vlgmr.msra.gmra.mrb[4].mxu1 %vm77_vm0, %v6179_v59 }
 0x271   :  { %4874 = vmatprep.mubr.msk.f32.mxu1 %vm394_vm1, %v588_v42 }
 0x272   :  { %v4869_v43 = vpop.f32.mrb[6].mxu0 }
 0x273   :  { %v773_v44 = vpop.f32.mrb[7].mxu0 }
 0x33b   :  { %v4836_v47 = vpop.f32.mrb[2].mxu1 }
 0x33c   :  { %v479_v48 = vadd.f32 %v4836_v47, %v6229_v45  ;;  %v473_v49 = vpop.f32.mrb[3].mxu1 }
 0x33d   :  { %v474_v50 = vadd.f32 %v473_v49, %v6231_v46 }
 0x33e   :  { %v486_v51 = vsel %vm482_vm3, %v479_v48, -inf }
 0x33f   :  { %487 = vmax.xlane.f32.xlu1 %v486_v51  ;;  %v483_v52 = vsel %vm482_vm3, %v474_v50, -inf }
 0x340   :  { %484 = vmax.xlane.f32.xlu0 %v483_v52 }
 0x343   :  { %v4858_v53 = vpop.f32.mrb[4].mxu1 }
 0x344   :  { %v684_v55 = vadd.f32 %v4858_v53, %v6177_v58  ;;  %v678_v56 = vpop.f32.mrb[5].mxu1 }
 0x345   :  { %v679_v57 = vadd.f32 %v678_v56, %v6177_v58 }
 0x347   :  { %v5298_v60 = vpack.c.bf16 %v684_v55, %v679_v57 }
 0x349   :  { %5300 = vmatprep.subr.msk.bf16.mxu1 %vm6206_vm2, %v5298_v60 }
 0x34a   :  { %5303 = vmatpush3.bf16.xpose.msk.msra.mxu1 %vm6206_vm2, %v5298_v60 }
 0x351   :  { %4875 = vmatmul.mubr.msk.f32.vlgmr.msra.gmra.mrb[6].mxu1 %vm394_vm1, %v593_v61 }
 0x3cc   :  { %v488_v62 = vpop.xlane.xlu1 %487 }
 0x3cd   :  { %v490_v0 = vsub.f32 %v479_v48, %v488_v62  ;;  %v485_v58 = vpop.xlane.xlu0 %484 }
 0x3ce   :  { %v489_v4 = vsub.f32 %v474_v50, %v485_v58 }
 0x3cf   :  { %v493_v1 = vmul.f32 1.442695, %v490_v0 }
 0x3d0   :  { %v491_v63 = vmul.f32 1.442695, %v489_v4 }
 0x3d1   :  { %5824 = vpow2.f32 %v493_v1 }
 0x3d2   :  { %5826 = vpow2.f32 %v491_v63 }
 0x3db   :  { %v5825_v2 = vpop.eup %5824 }
 0x3dc   :  { %v498_v3 = vsel %vm482_vm3, %v5825_v2, 0.0  ;;  %v5827_v14 = vpop.eup %5826 }
 0x3dd   :  { %499 = vadd.xlane.f32.xlu1 %v498_v3  ;;  %v495_v15 = vsel %vm482_vm3, %v5827_v14, 0.0 }
 0x3ee   :  { %704 = vrot.lane.b32.xlu1 %v6213_v28, %s6022_s3 }
 0x3f2   :  { %5646 = vrot.lane.b32.xlu1 %v6149_v23, %s6025_s13 }
 0x424   :  { %v4876_v5 = vpop.f32.mrb[6].mxu1 }
 0x425   :  { %v860_v8 = vpop.f32.mrb[7].mxu1  ;;  %v866_v11 = vadd.f32 %v4876_v5, %v6229_v45 }
 0x426   :  { %v861_v9 = vadd.f32 %v860_v8, %v6231_v46 }
 0x427   :  { %v872_v13 = vsel %vm482_vm3, %v866_v11, -inf }
 0x428   :  { %v869_v12 = vsel %vm482_vm3, %v861_v9, -inf }
 0x429   :  { %870 = vmax.xlane.f32.xlu0 %v869_v12 }
 0x42d   :  { %873 = vmax.xlane.f32.xlu0 %v872_v13 }
 0x431   :  { %496 = vadd.xlane.f32.xlu0 %v495_v15 }
 0x447   :  { %5641 = vrot.lane.b32.xlu0 %v6133_v6, %s6025_s13 }
 0x46a   :  { %v500_v16 = vpop.xlane.xlu1 %499 }
 0x46e   :  { %v705_v17 = vpop.permute.xlu1 %704 }
 0x46f   :  { %v774_v18 = vadd.f32 %v773_v44, %v705_v17  ;;  %v779_v19 = vadd.f32 %v4869_v43, %v705_v17 }
 0x471   :  { %v5304_v20 = vpack.c.bf16 %v779_v19, %v774_v18 }
 0x472   :  { %v5647_v38 = vpop.permute.xlu1 %5646 }
 0x473   :  { %5305 = vmatprep.subr.bf16.mxu1 %v5304_v20  ;;  %v5649_v41 = vunpack.i.h.bf16 %v5647_v38  ;;  %v5648_v42 = vunpack.i.l.bf16 %v5647_v38 }
 0x474   :  { %5307 = vmatpush3.bf16.msra.mxu1 %v5304_v20 }
 0x475   :  { %v5324_v50 = vpack.c.bf16 %v5649_v41, %v5648_v42 }
 0x4b6   :  { %v871_v21 = vpop.xlane.xlu0 %870 }
 0x4b7   :  { %v875_v22 = vsub.f32 %v861_v9, %v871_v21 }
 0x4b9   :  { %v877_v24 = vmul.f32 1.442695, %v875_v22 }
 0x4ba   :  { %v874_v26 = vpop.xlane.xlu0 %873 }
 0x4bb   :  { %5828 = vpow2.f32 %v877_v24  ;;  %v876_v27 = vsub.f32 %v866_v11, %v874_v26 }
 0x4bc   :  { %5830 = vrcp.f32 %v500_v16 }
 0x4bd   :  { %v879_v29 = vmul.f32 1.442695, %v876_v27 }
 0x4be   :  { %v497_v31 = vpop.xlane.xlu0 %496 }
 0x4bf   :  { %5832 = vpow2.f32 %v879_v29 }
 0x4c0   :  { %5834 = vrcp.f32 %v497_v31 }
 0x4c2   :  { %v5642_v32 = vpop.permute.xlu0 %5641 }
 0x4c3   :  { %v5644_v33 = vunpack.i.h.bf16 %v5642_v32  ;;  %v5643_v35 = vunpack.i.l.bf16 %v5642_v32 }
 0x4c5   :  { %v5829_v36 = vpop.eup %5828  ;;  %v5320_v37 = vpack.c.bf16 %v5644_v33, %v5643_v35 }
 0x4c6   :  { %v881_v39 = vsel %vm482_vm3, %v5829_v36, 0.0  ;;  %v5831_v40 = vpop.eup %5830 }
 0x4c7   :  { %882 = vadd.xlane.f32.xlu0 %v881_v39  ;;  %5321 = vmatprep.subr.bf16.mxu0 %v5320_v37  ;;  %v504_v49 = vmul.f32 %v5831_v40, %v5825_v2 }
 0x4c9   :  { %v5833_v43 = vpop.eup %5832 }
 0x4ca   :  { %v5835_v44 = vpop.eup %5834  ;;  %v884_v47 = vsel %vm482_vm3, %v5833_v43, 0.0 }
 0x4cb   :  { %885 = vadd.xlane.f32.xlu1 %v884_v47  ;;  %v502_v48 = vmul.f32 %v5835_v44, %v5827_v14 }
 0x4cd   :  { %4888 = vmatprep.mubr.msk.f32.mxu0 %vm482_vm3, %v502_v48 }
 0x4ce   :  { %4889 = vmatmul.mubr.msk.f32.vlgmr.msra.gmra.mrb[8].mxu0 %vm482_vm3, %v504_v49 }
 0x4cf   :  { %5323 = vmatpush3.bf16.msra.mxu0 %v5320_v37  ;;  %4910 = vmatprep.mubr.msk.f32.mxu0 %vm77_vm0, %v6171_v54 }
 0x4d0   :  { %5325 = vmatprep.subr.bf16.mxu0 %v5324_v50 }
 0x4d3   :  { %5327 = vmatpush3.bf16.msra.mxu0 %v5324_v50 }
 0x4d6   :  { %4911 = vmatmul.mubr.msk.f32.vlgmr.msra.gmra.mrb[10].mxu0 %vm77_vm0, %v6179_v59 }
 0x4dc   :  { %5651 = vrot.lane.b32.xlu1 %v6133_v6, %s6026_s14 }
 0x4dd   :  { %5656 = vrot.lane.b32.xlu0 %v6149_v23, %s6026_s14 }
 0x4e0   :  { %5661 = vrot.lane.b32.xlu1 %v6143_v10, %s6027_s15 }
 0x4e1   :  { %5666 = vrot.lane.b32.xlu0 %v6163_v34, %s6027_s15 }
 0x4e4   :  { %5671 = vrot.lane.b32.xlu1 %v6133_v6, %s6028_s16 }
 0x4e5   :  { %1155 = vrot.lane.b32.xlu0 %v6139_v7, %s6026_s14 }
 0x4e8   :  { %5676 = vrot.lane.b32.xlu1 %v6149_v23, %s6028_s16 }
 0x4e9   :  { %5681 = vrot.lane.b32.xlu0 %v6133_v6, %s6029_s17 }
 0x4ec   :  { %1065 = vrot.lane.b32.xlu1 %v6159_v30, %s6026_s14 }
 0x4ed   :  { %5686 = vrot.lane.b32.xlu0 %v6149_v23, %s6029_s17 }
 0x4f0   :  { %1617 = vrot.lane.b32.xlu1 %v6139_v7, %s6028_s16 }
 0x4f1   :  { %1527 = vrot.lane.b32.xlu0 %v6159_v30, %s6028_s16 }
 0x554   :  { %v883_v51 = vpop.xlane.xlu0 %882 }
 0x555   :  { %5836 = vrcp.f32 %v883_v51 }
 0x558   :  { %v886_v52 = vpop.xlane.xlu1 %885  ;;  %v5657_v57 = vpop.permute.xlu0 %5656 }
 0x559   :  { %5838 = vrcp.f32 %v886_v52  ;;  %v5659_v0 = vunpack.i.h.bf16 %v5657_v57  ;;  %v5658_v1 = vunpack.i.l.bf16 %v5657_v57 }
 0x55b   :  { %v5316_v30 = vpack.c.bf16 %v5659_v0, %v5658_v1 }
 0x55c   :  { %v5652_v53 = vpop.permute.xlu1 %5651  ;;  %v5667_v63 = vpop.permute.xlu0 %5666 }
 0x55d   :  { %v5654_v55 = vunpack.i.h.bf16 %v5652_v53  ;;  %v5653_v56 = vunpack.i.l.bf16 %v5652_v53  ;;  %v5669_v9 = vunpack.i.h.bf16 %v5667_v63  ;;  %v5668_v11 = vunpack.i.l.bf16 %v5667_v63 }
 0x55f   :  { %v5837_v60 = vpop.eup %5836  ;;  %v5312_v61 = vpack.c.bf16 %v5654_v55, %v5653_v56  ;;  %v5332_v13 = vpack.c.bf16 %v5669_v9, %v5668_v11 }
 0x560   :  { %v888_v62 = vmul.f32 %v5837_v60, %v5829_v36  ;;  %v5662_v2 = vpop.permute.xlu1 %5661  ;;  %v1156_v12 = vpop.permute.xlu0 %1155 }
 0x561   :  { %5313 = vmatprep.subr.bf16.mxu1 %v5312_v61  ;;  %v5664_v58 = vunpack.i.h.bf16 %v5662_v2  ;;  %v5663_v4 = vunpack.i.l.bf16 %v5662_v2 }
 0x562   :  { %4881 = vmatprep.mubr.msk.f32.mxu1 %vm482_vm3, %v888_v62 }
 0x563   :  { %v5839_v7 = vpop.eup %5838  ;;  %v5328_v8 = vpack.c.bf16 %v5664_v58, %v5663_v4 }
 0x564   :  { %v890_v3 = vmul.f32 %v5839_v7, %v5833_v43  ;;  %v5672_v5 = vpop.permute.xlu1 %5671  ;;  %v5682_v17 = vpop.permute.xlu0 %5681 }
 0x565   :  { %v5674_v14 = vunpack.i.h.bf16 %v5672_v5  ;;  %v5673_v15 = vunpack.i.l.bf16 %v5672_v5  ;;  %v5684_v22 = vunpack.i.h.bf16 %v5682_v17  ;;  %v5683_v24 = vunpack.i.l.bf16 %v5682_v17 }
 0x566   :  { %4882 = vmatmul.mubr.msk.f32.vlgmr.msra.gmra.mrb[8].mxu1 %vm482_vm3, %v890_v3 }
 0x567   :  { %5315 = vmatpush3.bf16.msra.mxu1 %v5312_v61  ;;  %4899 = vmatprep.mubr.msk.f32.mxu1 %vm77_vm0, %v6171_v54  ;;  %v5346_v18 = vpack.c.bf16 %v5674_v14, %v5673_v15  ;;  %v5354_v27 = vpack.c.bf16 %v5684_v22, %v5683_v24 }
 0x568   :  { %5317 = vmatprep.subr.bf16.mxu1 %v5316_v30  ;;  %v5677_v16 = vpop.permute.xlu1 %5676  ;;  %v5687_v26 = vpop.permute.xlu0 %5686 }
 0x569   :  { %v5679_v19 = vunpack.i.h.bf16 %v5677_v16  ;;  %v5678_v20 = vunpack.i.l.bf16 %v5677_v16  ;;  %v5689_v29 = vunpack.i.h.bf16 %v5687_v26  ;;  %v5688_v31 = vunpack.i.l.bf16 %v5687_v26 }
 0x56b   :  { %5319 = vmatpush3.bf16.msra.mxu1 %v5316_v30  ;;  %v5350_v21 = vpack.c.bf16 %v5679_v19, %v5678_v20  ;;  %v5358_v32 = vpack.c.bf16 %v5689_v29, %v5688_v31 }
 0x56c   :  { %5329 = vmatprep.subr.bf16.mxu1 %v5328_v8  ;;  %v1066_v41 = vpop.permute.xlu1 %1065  ;;  %v1528_v50 = vpop.permute.xlu0 %1527 }
 0x56e   :  { %4900 = vmatmul.mubr.msk.f32.vlgmr.msra.gmra.mrb[10].mxu1 %vm77_vm0, %v6179_v59 }
 0x56f   :  { %5331 = vmatpush3.bf16.msra.mxu1 %v5328_v8  ;;  %4921 = vmatprep.mubr.msk.f32.mxu1 %vm77_vm0, %v6171_v54 }
 0x570   :  { %5333 = vmatprep.subr.bf16.mxu1 %v5332_v13  ;;  %v1618_v55 = vpop.permute.xlu1 %1617 }
 0x573   :  { %5335 = vmatpush3.bf16.msra.mxu1 %v5332_v13 }
 0x574   :  { %5347 = vmatprep.subr.bf16.mxu1 %v5346_v18 }
 0x576   :  { %4922 = vmatmul.mubr.msk.f32.vlgmr.msra.gmra.mrb[12].mxu1 %vm77_vm0, %v6179_v59 }
 0x577   :  { %5349 = vmatpush3.bf16.msra.mxu1 %v5346_v18  ;;  %4946 = vmatprep.mubr.msk.f32.mxu1 %vm77_vm0, %v6171_v54 }
 0x578   :  { %5351 = vmatprep.subr.bf16.mxu1 %v5350_v21 }
 0x57b   :  { %5353 = vmatpush3.bf16.msra.mxu1 %v5350_v21 }
 0x57c   :  { %5355 = vmatprep.subr.bf16.mxu1 %v5354_v27 }
 0x57e   :  { %4947 = vmatmul.mubr.msk.f32.vlgmr.msra.gmra.mrb[14].mxu1 %vm77_vm0, %v6179_v59 }
 0x57f   :  { %5357 = vmatpush3.bf16.msra.mxu1 %v5354_v27  ;;  %4957 = vmatprep.mubr.msk.f32.mxu1 %vm77_vm0, %v6171_v54 }
 0x580   :  { %5359 = vmatprep.subr.bf16.mxu1 %v5358_v32 }
 0x583   :  { %5361 = vmatpush3.bf16.msra.mxu1 %v5358_v32 }
 0x586   :  { %4958 = vmatmul.mubr.msk.f32.vlgmr.msra.gmra.mrb[16].mxu1 %vm77_vm0, %v6179_v59 }
 0x5a9   :  { %v4912_v33 = vpop.f32.mrb[10].mxu0 }
 0x5aa   :  { %v1230_v35 = vadd.f32 %v4912_v33, %v1156_v12  ;;  %v1224_v36 = vpop.f32.mrb[11].mxu0 }
 0x5ab   :  { %v1225_v37 = vadd.f32 %v1224_v36, %v1156_v12 }
 0x5ad   :  { %v5336_v38 = vpack.c.bf16 %v1230_v35, %v1225_v37 }
 0x5af   :  { %5338 = vmatprep.subr.msk.bf16.mxu0 %vm6206_vm2, %v5336_v38 }
 0x5b0   :  { %5341 = vmatpush3.bf16.xpose.msk.msra.mxu0 %vm6206_vm2, %v5336_v38 }
 0x639   :  { %v6311_v39 = vpop.f32.mrb[8].mxu1 }
 0x63a   :  { %v6313_v40 = vpop.f32.mrb[9].mxu1 }
 0x641   :  { %v4901_v42 = vpop.f32.mrb[10].mxu1 }
 0x642   :  { %v1134_v43 = vpop.f32.mrb[11].mxu1  ;;  %v1140_v47 = vadd.f32 %v4901_v42, %v1066_v41 }
 0x643   :  { %v1135_v44 = vadd.f32 %v1134_v43, %v1066_v41 }
 0x645   :  { %4928 = vmatprep.mubr.msk.f32.mxu0 %vm394_vm1, %v1135_v44 }
 0x646   :  { %4929 = vmatmul.mubr.msk.f32.vlgmr.msra.gmra.mrb[12].mxu0 %vm394_vm1, %v1140_v47 }
 0x649   :  { %v4923_v48 = vpop.f32.mrb[12].mxu1 }
 0x64a   :  { %v1314_v49 = vpop.f32.mrb[13].mxu1 }
 0x651   :  { %v4948_v51 = vpop.f32.mrb[14].mxu1 }
 0x652   :  { %v1596_v52 = vpop.f32.mrb[15].mxu1  ;;  %v1602_v0 = vadd.f32 %v4948_v51, %v1528_v50 }
 0x653   :  { %v1597_v53 = vadd.f32 %v1596_v52, %v1528_v50 }
 0x655   :  { %4975 = vmatprep.mubr.msk.f32.mxu1 %vm394_vm1, %v1597_v53 }
 0x659   :  { %v4959_v56 = vpop.f32.mrb[16].mxu1 }
 0x65a   :  { %v1692_v57 = vadd.f32 %v4959_v56, %v1618_v55  ;;  %v1686_v60 = vpop.f32.mrb[17].mxu1 }
 0x65b   :  { %v1687_v61 = vadd.f32 %v1686_v60, %v1618_v55 }
 0x65d   :  { %v5370_v62 = vpack.c.bf16 %v1692_v57, %v1687_v61 }
 0x65f   :  { %5372 = vmatprep.subr.msk.bf16.mxu1 %vm6206_vm2, %v5370_v62 }
 0x660   :  { %5375 = vmatpush3.bf16.xpose.msk.msra.mxu1 %vm6206_vm2, %v5370_v62 }
 0x667   :  { %4976 = vmatmul.mubr.msk.f32.vlgmr.msra.gmra.mrb[18].mxu1 %vm394_vm1, %v1602_v0 }
 0x719   :  { %v4930_v1 = vpop.f32.mrb[12].mxu0 }
 0x71a   :  { %v1407_v2 = vadd.f32 %v4930_v1, %v6229_v45  ;;  %v1401_v7 = vpop.f32.mrb[13].mxu0 }
 0x71b   :  { %v1402_v3 = vadd.f32 %v1401_v7, %v6231_v46 }
 0x71c   :  { %v1413_v30 = vsel %vm482_vm3, %v1407_v2, -inf }
 0x71d   :  { %1414 = vmax.xlane.f32.xlu0 %v1413_v30  ;;  %v1410_v58 = vsel %vm482_vm3, %v1402_v3, -inf }
 0x71e   :  { %1411 = vmax.xlane.f32.xlu1 %v1410_v58 }
 0x72f   :  { %1245 = vrot.lane.b32.xlu1 %v6213_v28, %s6027_s15 }
 0x733   :  { %5696 = vrot.lane.b32.xlu1 %v6163_v34, %s6030_s19 }
 0x73a   :  { %v4977_v4 = vpop.f32.mrb[18].mxu1 }
 0x73b   :  { %v1863_v63 = vpop.f32.mrb[19].mxu1  ;;  %v1869_v29 = vadd.f32 %v4977_v4, %v6229_v45  ;;  %v4479_v4 = vld [vmem:[#allocation7 + $0x5] ss:$0 sm:$0xff] }
 0x73c   :  { %v1864_v5 = vadd.f32 %v1863_v63, %v6231_v46 }
 0x73d   :  { %v1875_v31 = vsel %vm482_vm3, %v1869_v29, -inf }
 0x73e   :  { %v1872_v8 = vsel %vm482_vm3, %v1864_v5, -inf }
 0x757   :  { %1873 = vmax.xlane.f32.xlu1 %v1872_v8 }
 0x7aa   :  { %v1415_v9 = vpop.xlane.xlu0 %1414 }
 0x7ab   :  { %v1417_v11 = vsub.f32 %v1407_v2, %v1415_v9  ;;  %v1412_v12 = vpop.xlane.xlu1 %1411 }
 0x7ac   :  { %v1416_v13 = vsub.f32 %v1402_v3, %v1412_v12 }
 0x7ad   :  { %v1420_v14 = vmul.f32 1.442695, %v1417_v11 }
 0x7ae   :  { %v1418_v15 = vmul.f32 1.442695, %v1416_v13 }
 0x7af   :  { %5840 = vpow2.f32 %v1420_v14  ;;  %v1246_v16 = vpop.permute.xlu1 %1245 }
 0x7b0   :  { %v1315_v17 = vadd.f32 %v1314_v49, %v1246_v16  ;;  %v1320_v18 = vadd.f32 %v4923_v48, %v1246_v16  ;;  %5842 = vpow2.f32 %v1418_v15 }
 0x7b2   :  { %v5342_v19 = vpack.c.bf16 %v1320_v18, %v1315_v17 }
 0x7b3   :  { %v5697_v22 = vpop.permute.xlu1 %5696 }
 0x7b4   :  { %5343 = vmatprep.subr.bf16.mxu0 %v5342_v19  ;;  %v5699_v43 = vunpack.i.h.bf16 %v5697_v22  ;;  %v5698_v44 = vunpack.i.l.bf16 %v5697_v22 }
 0x7b5   :  { %5345 = vmatpush3.bf16.msra.mxu0 %v5342_v19 }
 0x7b6   :  { %v5366_v49 = vpack.c.bf16 %v5699_v43, %v5698_v44 }
 0x7b9   :  { %v5841_v34 = vpop.eup %5840 }
 0x7ba   :  { %v1425_v46 = vsel %vm482_vm3, %v5841_v34, 0.0  ;;  %v5843_v20 = vpop.eup %5842 }
 0x7bb   :  { %1426 = vadd.xlane.f32.xlu0 %v1425_v46  ;;  %v1422_v21 = vsel %vm482_vm3, %v5843_v20, 0.0 }
 0x7bf   :  { %1423 = vadd.xlane.f32.xlu0 %v1422_v21  ;;  %v2025_v21 = vld [vmem:[#allocation8 + $0x50] sm:$0xff] }
 0x7d5   :  { %5691 = vrot.lane.b32.xlu0 %v6143_v10, %s6030_s19 }
 0x7e4   :  { %v1874_v24 = vpop.xlane.xlu1 %1873 }
 0x7e5   :  { %v1878_v26 = vsub.f32 %v1864_v5, %v1874_v24  ;;  %v2026_v24 = vld [vmem:[#allocation8 + $0x58] sm:$0xff] }
 0x7e7   :  { %v1880_v27 = vmul.f32 1.442695, %v1878_v26  ;;  %v5392_v26 = vpack.c.bf16 %v2026_v24, %v2025_v21 }
 0x7e9   :  { %5844 = vpow2.f32 %v1880_v27  ;;  %v2027_v27 = vld [vmem:[#allocation8 + $0x60] sm:$0xff] }
 0x7f3   :  { %v5845_v32 = vpop.eup %5844 }
 0x7f4   :  { %1876 = vmax.xlane.f32.xlu0 %v1875_v31  ;;  %v1884_v33 = vsel %vm482_vm3, %v5845_v32, 0.0 }
 0x7f8   :  { %1885 = vadd.xlane.f32.xlu0 %v1884_v33 }
 0x80e   :  { %1707 = vrot.lane.b32.xlu0 %v6213_v28, %s6030_s19 }
 0x812   :  { %5706 = vrot.lane.b32.xlu0 %v6149_v23, %s6027_s15  ;;  %v2023_v23 = vld [vmem:[#allocation8 + $0x40] sm:$0xff] }
 0x848   :  { %v1427_v35 = vpop.xlane.xlu0 %1426 }
 0x849   :  { %5846 = vrcp.f32 %v1427_v35 }
 0x84c   :  { %v1424_v10 = vpop.xlane.xlu0 %1423 }
 0x84d   :  { %5848 = vrcp.f32 %v1424_v10 }
 0x850   :  { %v5692_v36 = vpop.permute.xlu0 %5691 }
 0x851   :  { %v5694_v37 = vunpack.i.h.bf16 %v5692_v36  ;;  %v5693_v38 = vunpack.i.l.bf16 %v5692_v36 }
 0x853   :  { %v5362_v41 = vpack.c.bf16 %v5694_v37, %v5693_v38  ;;  %v5847_v45 = vpop.eup %5846 }
 0x854   :  { %v1431_v48 = vmul.f32 %v5847_v45, %v5841_v34 }
 0x855   :  { %5363 = vmatprep.subr.bf16.mxu0 %v5362_v41 }
 0x857   :  { %v5849_v42 = vpop.eup %5848 }
 0x858   :  { %v1429_v47 = vmul.f32 %v5849_v42, %v5843_v20  ;;  %v2024_v20 = vld [vmem:[#allocation8 + $0x48] sm:$0xff] }
 0x859   :  { %v5388_v22 = vpack.c.bf16 %v2024_v20, %v2023_v23 }
 0x85a   :  { %4935 = vmatprep.mubr.msk.f32.mxu0 %vm482_vm3, %v1429_v47 }
 0x85b   :  { %4936 = vmatmul.mubr.msk.f32.vlgmr.msra.gmra.mrb[8].mxu0 %vm482_vm3, %v1431_v48  ;;  %5389 = vmatprep.subr.bf16.mxu1 %v5388_v22 }
 0x85c   :  { %5365 = vmatpush3.bf16.msra.mxu0 %v5362_v41  ;;  %4968 = vmatprep.mubr.msk.f32.mxu0 %vm77_vm0, %v6171_v54 }
 0x85d   :  { %5367 = vmatprep.subr.bf16.mxu0 %v5366_v49  ;;  %5391 = vmatpush3.bf16.msra.mxu1 %v5388_v22 }
 0x85e   :  { %5393 = vmatprep.subr.bf16.mxu1 %v5392_v26 }
 0x860   :  { %5369 = vmatpush3.bf16.msra.mxu0 %v5366_v49 }
 0x861   :  { %5395 = vmatpush3.bf16.msra.mxu1 %v5392_v26 }
 0x863   :  { %4969 = vmatmul.mubr.msk.f32.vlgmr.msra.gmra.mrb[14].mxu0 %vm77_vm0, %v6179_v59 }
 0x881   :  { %v1877_v28 = vpop.xlane.xlu0 %1876 }
 0x882   :  { %v1879_v50 = vsub.f32 %v1869_v29, %v1877_v28  ;;  %v2028_v29 = vld [vmem:[#allocation8 + $0x68] sm:$0xff] }
 0x883   :  { %v5396_v31 = vpack.c.bf16 %v2028_v29, %v2027_v27  ;;  %v4480_v28 = vld [vmem:[#allocation7 + $0x6] ss:$0 sm:$0xff] }
 0x884   :  { %v1882_v51 = vmul.f32 1.442695, %v1879_v50 }
 0x885   :  { %v1886_v52 = vpop.xlane.xlu0 %1885  ;;  %5397 = vmatprep.subr.bf16.mxu1 %v5396_v31 }
 0x886   :  { %5850 = vpow2.f32 %v1882_v51  ;;  %5399 = vmatpush3.bf16.msra.mxu1 %v5396_v31 }
 0x887   :  { %5852 = vrcp.f32 %v1886_v52 }
 0x889   :  { %v1708_v61 = vpop.permute.xlu0 %1707 }
 0x890   :  { %v5851_v53 = vpop.eup %5850 }
 0x891   :  { %v5853_v55 = vpop.eup %5852  ;;  %v1887_v56 = vsel %vm482_vm3, %v5851_v53, 0.0 }
 0x892   :  { %1888 = vadd.xlane.f32.xlu1 %v1887_v56  ;;  %v1891_v57 = vmul.f32 %v5853_v55, %v5845_v32 }
 0x894   :  { %4982 = vmatprep.mubr.msk.f32.mxu0 %vm482_vm3, %v1891_v57 }
 0x91f   :  { %v1889_v60 = vpop.xlane.xlu1 %1888 }
 0x920   :  { %5854 = vrcp.f32 %v1889_v60  ;;  %v2029_v60 = vld [vmem:[#allocation8 + $0x70] sm:$0xff] }
 0x92a   :  { %v5855_v3 = vpop.eup %5854 }
 0x92b   :  { %v1893_v30 = vmul.f32 %v5855_v3, %v5851_v53  ;;  %v4481_v53 = vld [vmem:[#allocation7 + $0x7] ss:$0 sm:$0xff]  ;;  %v2227_v3 = vld [vmem:[#allocation8 + $0xb8] sm:$0xff] }
 0x936   :  { %v4970_v62 = vpop.f32.mrb[14].mxu0 }
 0x937   :  { %v1782_v0 = vadd.f32 %v4970_v62, %v1708_v61  ;;  %v1776_v1 = vpop.f32.mrb[15].mxu0 }
 0x938   :  { %v1777_v2 = vadd.f32 %v1776_v1, %v1708_v61  ;;  %v2030_v61 = vld [vmem:[#allocation8 + $0x78] sm:$0xff]  ;;  %v2225_v1 = vld [vmem:[#allocation8 + $0xa8] sm:$0xff] }
 0x939   :  { %v5400_v62 = vpack.c.bf16 %v2030_v61, %v2029_v60  ;;  %v6441_v60 = vld [vmem:[#allocation7 + $0xc] ss:$0 sm:$0xff] }
 0x93a   :  { %v5376_v7 = vpack.c.bf16 %v1782_v0, %v1777_v2  ;;  %v2224_v0 = vld [vmem:[#allocation8 + $0xa0] sm:$0xff]  ;;  %v2226_v2 = vld [vmem:[#allocation8 + $0xb0] sm:$0xff] }
 0x93b   :  { %5401 = vmatprep.subr.bf16.mxu1 %v5400_v62  ;;  %v5408_v22 = vpack.c.bf16 %v2227_v3, %v2226_v2 }
 0x93c   :  { %5377 = vmatprep.subr.bf16.mxu0 %v5376_v7  ;;  %5403 = vmatpush3.bf16.msra.mxu1 %v5400_v62 }
 0x93d   :  { %5379 = vmatpush3.bf16.msra.mxu0 %v5376_v7  ;;  %v6373_v7 = vpack.i.bf16 %v2225_v1, %v2224_v0 }
 0x93f   :  { %5711 = vrot.lane.b32.xlu0 %v6373_v7, %s6022_s3 }
 0x940   :  { %4983 = vmatmul.mubr.msk.f32.vlgmr.msra.gmra.mrb[8].mxu0 %vm482_vm3, %v1893_v30  ;;  %v5404_v30 = vpack.c.bf16 %v2225_v1, %v2224_v0 }
 0xa13   :  { %v4984_v58 = vpop.f32.mrb[8].mxu0 }
 0xa14   :  { %v5572_v63 = vadd.f32 %v4984_v58, %v6311_v39  ;;  %v1966_v5 = vpop.f32.mrb[9].mxu0  ;;  %v2228_v58 = vld [vmem:[#allocation8 + $0x80] sm:$0xff] }
 0xa15   :  { %v5573_v8 = vadd.f32 %v1966_v5, %v6313_v40 }
 0xa16   :  { %v1982_v9 = vadd.f32 %v5572_v63, %v4479_v4  ;;  %v6377_v63 = vpack.i.bf16 %v2227_v3, %v2226_v2 }
 0xa17   :  { %v1981_v11 = vadd.f32 %v5573_v8, %v4479_v4  ;;  %v2229_v4 = vld [vmem:[#allocation8 + $0x88] sm:$0xff]  ;;  %v6385_v8 = vld [vmem:[#allocation7 + $0xb] ss:$0 sm:$0xff] }
 0xa18   :  { %v6357_v13 = vadd.f32 %v1982_v9, %v6179_v59  ;;  %v5420_v5 = vpack.c.bf16 %v2229_v4, %v2228_v58  ;;  %5716 = vrot.lane.b32.xlu0 %v6377_v63, %s6022_s3  ;;  %v6391_v9 = vpack.i.bf16 %v2229_v4, %v2228_v58 }
 0xa19   :  { %v6354_v12 = vadd.f32 %v1981_v11, %v6171_v54  ;;  %v6397_v11 = vld [vmem:[#allocation7 + $0xa] ss:$0 sm:$0xff] }
 0xa1a   :  { %v1988_v15 = vsel %vm77_vm0, %v6357_v13, 0.0  ;;  %5421 = vmatprep.subr.bf16.mxu1 %v5420_v5 }
 0xa1b   :  { %v1985_v14 = vsel %vm77_vm0, %v6354_v12, 0.0 }
 0xa1c   :  { %1986 = vadd.xlane.f32.xlu1 %v1985_v14  ;;  %5726 = vrot.lane.b32.xlu0 %v6377_v63, %s6024_s1  ;;  %v2230_v14 = vld [vmem:[#allocation8 + $0x90] sm:$0xff] }
 0xa20   :  { %1989 = vadd.xlane.f32.xlu1 %v1988_v15  ;;  %5736 = vrot.lane.b32.xlu0 %v6377_v63, %s6023_s12  ;;  %v2231_v15 = vld [vmem:[#allocation8 + $0x98] sm:$0xff] }
 0xa21   :  { %v5424_v24 = vpack.c.bf16 %v2231_v15, %v2230_v14 }
 0xa24   :  { %2616 = vrot.lane.b32.xlu0 %v6397_v11, %s6023_s12 }
 0xaa9   :  { %v1987_v39 = vpop.xlane.xlu1 %1986 }
 0xaaa   :  { %v1991_v40 = vmul.f32 0.03125, %v1987_v39  ;;  %v6401_v39 = vpack.i.bf16 %v2231_v15, %v2230_v14 }
 0xaac   :  { %v1993_v54 = vsub.f32 %v6354_v12, %v1991_v40  ;;  %5746 = vrot.lane.b32.xlu0 %v6401_v39, %s6022_s3  ;;  %v4482_v40 = vld [vmem:[#allocation7 + $0x8] ss:$0 sm:$0xff] }
 0xaad   :  { %v1990_v16 = vpop.xlane.xlu1 %1989 }
 0xaae   :  { %v1992_v17 = vmul.f32 0.03125, %v1990_v16  ;;  %v1995_v34 = vmul.f32 %v1993_v54, %v1993_v54 }
 0xab0   :  { %v1994_v59 = vsub.f32 %v6357_v13, %v1992_v17  ;;  %v1997_v46 = vsel %vm77_vm0, %v1995_v34, 0.0 }
 0xab2   :  { %v1996_v18 = vmul.f32 %v1994_v59, %v1994_v59 }
 0xab4   :  { %v2000_v19 = vsel %vm77_vm0, %v1996_v18, 0.0 }
 0xab5   :  { %2001 = vadd.xlane.f32.xlu1 %v2000_v19 }
 0xab9   :  { %1998 = vadd.xlane.f32.xlu1 %v1997_v46 }
 0xaca   :  { %5701 = vrot.lane.b32.xlu1 %v6133_v6, %s6027_s15  ;;  %v5707_v6 = vpop.permute.xlu0 %5706 }
 0xacb   :  { %v5709_v38 = vunpack.i.h.bf16 %v5707_v6  ;;  %v5708_v41 = vunpack.i.l.bf16 %v5707_v6  ;;  %v4485_v6 = vld [vmem:[#allocation7 + $0x9] ss:$0 sm:$0xff] }
 0xacd   :  { %v5384_v47 = vpack.c.bf16 %v5709_v38, %v5708_v41 }
 0xace   :  { %5721 = vrot.lane.b32.xlu1 %v6373_v7, %s6024_s1  ;;  %v5712_v34 = vpop.permute.xlu0 %5711 }
 0xacf   :  { %v5714_v23 = vunpack.i.h.bf16 %v5712_v34  ;;  %v5713_v20 = vunpack.i.l.bf16 %v5712_v34 }
 0xad1   :  { %v5412_v21 = vpack.c.bf16 %v5714_v23, %v5713_v20 }
 0xad2   :  { %5731 = vrot.lane.b32.xlu1 %v6373_v7, %s6023_s12 }
 0xad6   :  { %2707 = vrot.lane.b32.xlu1 %v6385_v8, %s6023_s12 }
 0xada   :  { %5741 = vrot.lane.b32.xlu1 %v6391_v9, %s6022_s3 }
 0xb42   :  { %v2002_v32 = vpop.xlane.xlu1 %2001 }
 0xb43   :  { %v2004_v33 = vmul.f32 0.03125, %v2002_v32  ;;  %v5717_v32 = vpop.permute.xlu0 %5716 }
 0xb44   :  { %v5719_v38 = vunpack.i.h.bf16 %v5717_v32 }
 0xb45   :  { %v2006_v35 = vadd.f32 1e-06, %v2004_v33 }
 0xb46   :  { %v1999_v10 = vpop.xlane.xlu1 %1998 }
 0xb47   :  { %5856 = vrsqrt.f32 %v2006_v35  ;;  %v2003_v36 = vmul.f32 0.03125, %v1999_v10  ;;  %v6409_v33 = vpop.permute.xlu0 %5726 }
 0xb48   :  { %v5728_v34 = vunpack.i.l.bf16 %v6409_v33 }
 0xb49   :  { %v2005_v37 = vadd.f32 1e-06, %v2003_v36 }
 0xb4a   :  { %v5702_v45 = vpop.permute.xlu1 %5701 }
 0xb4b   :  { %5858 = vrsqrt.f32 %v2005_v37  ;;  %v5704_v42 = vunpack.i.h.bf16 %v5702_v45  ;;  %v5703_v43 = vunpack.i.l.bf16 %v5702_v45  ;;  %v5737_v35 = vpop.permute.xlu0 %5736 }
 0xb4d   :  { %v5380_v44 = vpack.c.bf16 %v5704_v42, %v5703_v43  ;;  %v5718_v42 = vunpack.i.l.bf16 %v5717_v32 }
 0xb4e   :  { %v6407_v46 = vpop.permute.xlu1 %5721 }
 0xb4f   :  { %5381 = vmatprep.subr.bf16.mxu0 %v5380_v44  ;;  %v6413_v37 = vpop.permute.xlu0 %2616  ;;  %v5724_v4 = vunpack.i.h.bf16 %v6407_v46 }
 0xb50   :  { %5383 = vmatpush3.bf16.msra.mxu0 %v5380_v44  ;;  %v5739_v44 = vunpack.i.h.bf16 %v5737_v35 }
 0xb51   :  { %v5857_v48 = vpop.eup %5856  ;;  %5385 = vmatprep.subr.bf16.mxu0 %v5384_v47 }
 0xb52   :  { %v2010_v49 = vmul.f32 %v5857_v48, %v1994_v59  ;;  %v5732_v26 = vpop.permute.xlu1 %5731 }
 0xb53   :  { %v5734_v27 = vunpack.i.h.bf16 %v5732_v26  ;;  %v5733_v29 = vunpack.i.l.bf16 %v5732_v26 }
 0xb54   :  { %5387 = vmatpush3.bf16.msra.mxu0 %v5384_v47  ;;  %v2016_v52 = vmul.f32 %v4480_v28, %v2010_v49  ;;  %v5738_v47 = vunpack.i.l.bf16 %v5737_v35 }
 0xb55   :  { %v5859_v50 = vpop.eup %5858  ;;  %5405 = vmatprep.subr.bf16.mxu0 %v5404_v30  ;;  %v5434_v31 = vpack.c.bf16 %v5734_v27, %v5733_v29 }
 0xb56   :  { %v2009_v51 = vmul.f32 %v5859_v50, %v1993_v54  ;;  %v2022_v57 = vadd.f32 %v4481_v53, %v2016_v52  ;;  %v6411_v10 = vpop.permute.xlu1 %2707  ;;  %v5416_v52 = vpack.c.bf16 %v5719_v38, %v5718_v42 }
 0xb58   :  { %v2015_v55 = vmul.f32 %v4480_v28, %v2009_v51 }
 0xb5a   :  { %v2021_v56 = vadd.f32 %v4481_v53, %v2015_v55  ;;  %v5742_v48 = vpop.permute.xlu1 %5741  ;;  %v5438_v53 = vpack.c.bf16 %v5739_v44, %v5738_v47  ;;  %v5747_v55 = vpop.permute.xlu0 %5746 }
 0xb5b   :  { %v5744_v50 = vunpack.i.h.bf16 %v5742_v48  ;;  %v5743_v51 = vunpack.i.l.bf16 %v5742_v48 }
 0xb5c   :  { %4993 = vmatprep.mubr.msk.f32.mxu0 %vm77_vm0, %v2021_v56  ;;  %v5748_v56 = vunpack.i.l.bf16 %v5747_v55 }
 0xb5d   :  { %4994 = vmatmul.mubr.msk.f32.vlgmr.msra.gmra.mrb[16].mxu0 %vm77_vm0, %v2022_v57 }
 0xb5e   :  { %5407 = vmatpush3.bf16.msra.mxu0 %v5404_v30 }
 0xb5f   :  { %5409 = vmatprep.subr.bf16.mxu0 %v5408_v22 }
 0xb62   :  { %5411 = vmatpush3.bf16.msra.mxu0 %v5408_v22 }
 0xb63   :  { %5413 = vmatprep.subr.bf16.mxu0 %v5412_v21 }
 0xc30   :  { %v4995_v16 = vpop.f32.mrb[16].mxu0 }
 0xc31   :  { %v2125_v17 = vadd.f32 %v4995_v16, %v4482_v40  ;;  %v2119_v54 = vpop.f32.mrb[17].mxu0 }
 0xc32   :  { %v2120_v59 = vadd.f32 %v4482_v40, %v2119_v54 }
 0xc33   :  { %v2129_v19 = vmax.f32 %v2125_v17, 0.0 }
 0xc34   :  { %v2128_v18 = vmax.f32 %v2120_v59, 0.0 }
 0xc36   :  { %5012 = vmatprep.mubr.msk.f32.mxu1 %vm2134_vm4, %v2128_v18 }
 0xc37   :  { %5013 = vmatmul.mubr.msk.f32.vlgmr.msra.gmra.mrb[20].mxu1 %vm2134_vm4, %v2129_v19  ;;  %v5729_v19 = vunpack.i.h.bf16 %v6409_v33 }
 0xc38   :  { %5423 = vmatpush3.bf16.msra.mxu1 %v5420_v5  ;;  %v5723_v5 = vunpack.i.l.bf16 %v6407_v46 }
 0xc39   :  { %5425 = vmatprep.subr.bf16.mxu1 %v5424_v24  ;;  %v5446_v20 = vpack.c.bf16 %v5729_v19, %v5728_v34 }
 0xc3a   :  { %v5442_v59 = vpack.c.bf16 %v5724_v4, %v5723_v5 }
 0xc3c   :  { %5427 = vmatpush3.bf16.msra.mxu1 %v5424_v24 }
 0xc3d   :  { %5435 = vmatprep.subr.bf16.mxu1 %v5434_v31 }
 0xd0a   :  { %v5014_v36 = vpop.f32.mrb[20].mxu1 }
 0xd0b   :  { %v2213_v41 = vadd.f32 %v5014_v36, %v4485_v6  ;;  %v2207_v45 = vpop.f32.mrb[21].mxu1  ;;  %v6481_v36 = vld [vmem:[#allocation5 + $0x8] sm:$0xff] }
 0xd0c   :  { %v2208_v43 = vadd.f32 %v4485_v6, %v2207_v45 }
 0xd0d   :  { %v6419_v28 = vadd.f32 %v2213_v41, %v6357_v13  ;;  %v5749_v13 = vunpack.i.h.bf16 %v5747_v55  ;;  %v6484_v41 = vld [vmem:[#allocation5] sm:$0xff] }
 0xd0e   :  { %v6416_v49 = vadd.f32 %v2208_v43, %v6354_v12  ;;  %v5450_v12 = vpack.c.bf16 %v5744_v50, %v5743_v51 }
 0xd0f   :  { %v5454_v57 = vpack.c.bf16 %v5749_v13, %v5748_v56 }
 0xd10   :  { %5023 = vmatprep.mubr.msk.f32.mxu0 %vm77_vm0, %v6416_v49  ;;  %5045 = vmatprep.mubr.msk.f32.mxu1 %vm77_vm0, %v6416_v49 }
 0xd11   :  { %5024 = vmatmul.mubr.msk.f32.vlgmr.msra.gmra.mrb[18].mxu0 %vm77_vm0, %v6419_v28  ;;  %5046 = vmatmul.mubr.msk.f32.vlgmr.msra.gmra.mrb[22].mxu1 %vm77_vm0, %v6419_v28 }
 0xd12   :  { %5415 = vmatpush3.bf16.msra.mxu0 %v5412_v21  ;;  %5437 = vmatpush3.bf16.msra.mxu1 %v5434_v31 }
 0xd13   :  { %5034 = vmatprep.mubr.msk.f32.mxu0 %vm77_vm0, %v6416_v49  ;;  %5063 = vmatprep.mubr.msk.f32.mxu1 %vm77_vm0, %v6416_v49 }
 0xd14   :  { %5417 = vmatprep.subr.bf16.mxu0 %v5416_v52  ;;  %5439 = vmatprep.subr.bf16.mxu1 %v5438_v53 }
 0xd16   :  { %5419 = vmatpush3.bf16.msra.mxu0 %v5416_v52  ;;  %5441 = vmatpush3.bf16.msra.mxu1 %v5438_v53 }
 0xd17   :  { %5451 = vmatprep.subr.bf16.mxu1 %v5450_v12 }
 0xd19   :  { %5035 = vmatmul.mubr.msk.f32.vlgmr.msra.gmra.mrb[20].mxu0 %vm77_vm0, %v6419_v28  ;;  %5064 = vmatmul.mubr.msk.f32.vlgmr.msra.gmra.mrb[24].mxu1 %vm77_vm0, %v6419_v28 }
 0xd1a   :  { %5453 = vmatpush3.bf16.msra.mxu1 %v5450_v12  ;;  %5085 = vmatprep.mubr.msk.f32.mxu1 %vm77_vm0, %v6416_v49 }
 0xd1b   :  { %5455 = vmatprep.subr.bf16.mxu1 %v5454_v57 }
 0xd1e   :  { %5457 = vmatpush3.bf16.msra.mxu1 %v5454_v57 }
 0xd21   :  { %5086 = vmatmul.mubr.msk.f32.vlgmr.msra.gmra.mrb[26].mxu1 %vm77_vm0, %v6419_v28 }
 0xde4   :  { %v5025_v61 = vpop.f32.mrb[18].mxu0  ;;  %v5047_v62 = vpop.f32.mrb[22].mxu1 }
 0xde5   :  { %v2491_v0 = vadd.f32 %v5047_v62, %v6441_v60  ;;  %v2311_v1 = vpop.f32.mrb[19].mxu0  ;;  %v2485_v2 = vpop.f32.mrb[23].mxu1  ;;  %v2317_v21 = vadd.f32 %v5025_v61, %v6397_v11 }
 0xde6   :  { %v2312_v3 = vadd.f32 %v6397_v11, %v2311_v1  ;;  %v2486_v30 = vadd.f32 %v6441_v60, %v2485_v2 }
 0xde8   :  { %v6446_v58 = vpack.c.bf16 %v2491_v0, %v2486_v30  ;;  %5052 = vmatprep.mubr.msk.f32.mxu0 %vm394_vm1, %v2312_v3 }
 0xdec   :  { %v5036_v14 = vpop.f32.mrb[20].mxu0  ;;  %v5065_v15 = vpop.f32.mrb[24].mxu1 }
 0xded   :  { %v2412_v40 = vadd.f32 %v5036_v14, %v6385_v8  ;;  %v2406_v16 = vpop.f32.mrb[21].mxu0  ;;  %v2685_v17 = vpop.f32.mrb[25].mxu1  ;;  %v2691_v35 = vadd.f32 %v5065_v15, %v6413_v37 }
 0xdee   :  { %v2407_v54 = vadd.f32 %v6385_v8, %v2406_v16  ;;  %v2686_v22 = vadd.f32 %v2685_v17, %v6413_v37 }
 0xdf0   :  { %v5428_v18 = vpack.c.bf16 %v2412_v40, %v2407_v54 }
 0xdf2   :  { %5430 = vmatprep.subr.msk.bf16.mxu0 %vm6206_vm2, %v5428_v18 }
 0xdf3   :  { %5433 = vmatpush3.bf16.xpose.msk.msra.mxu0 %vm6206_vm2, %v5428_v18 }
 0xdf4   :  { %v6459_v46 = vpop.f32.mrb[26].mxu1  ;;  %5443 = vmatprep.subr.bf16.mxu0 %v5442_v59 }
 0xdf5   :  { %v6461_v23 = vpop.f32.mrb[27].mxu1 }
 0xdfa   :  { %5053 = vmatmul.mubr.msk.f32.vlgmr.msra.gmra.mrb[22].mxu0 %vm394_vm1, %v2317_v21 }
 0xdfb   :  { %5445 = vmatpush3.bf16.msra.mxu0 %v5442_v59  ;;  %5074 = vmatprep.mubr.msk.f32.mxu0 %vm77_vm0, %v6416_v49 }
 0xdfc   :  { %5447 = vmatprep.subr.bf16.mxu0 %v5446_v20 }
 0xdff   :  { %5449 = vmatpush3.bf16.msra.mxu0 %v5446_v20 }
 0xe02   :  { %5075 = vmatmul.mubr.msk.f32.vlgmr.msra.gmra.mrb[24].mxu0 %vm77_vm0, %v6419_v28 }
 0xe03   :  { %5092 = vmatprep.mubr.msk.f32.mxu0 %vm394_vm1, %v2686_v22 }
 0xecd   :  { %v5054_v24 = vpop.f32.mrb[22].mxu0 }
 0xece   :  { %v2572_v26 = vpop.f32.mrb[23].mxu0  ;;  %v2578_v44 = vadd.f32 %v6481_v36, %v5054_v24 }
 0xecf   :  { %v2573_v42 = vadd.f32 %v6484_v41, %v2572_v26 }
 0xed0   :  { %v2584_v48 = vsel %vm482_vm3, %v2578_v44, -inf }
 0xed1   :  { %v2581_v47 = vsel %vm482_vm3, %v2573_v42, -inf }
 0xed5   :  { %v5076_v27 = vpop.f32.mrb[24].mxu0 }
 0xed6   :  { %v2782_v29 = vadd.f32 %v5076_v27, %v6411_v10  ;;  %v2776_v31 = vpop.f32.mrb[25].mxu0 }
 0xed7   :  { %v2777_v32 = vadd.f32 %v2776_v31, %v6411_v10 }
 0xed9   :  { %v5458_v33 = vpack.c.bf16 %v2782_v29, %v2777_v32 }
 0xedb   :  { %5460 = vmatprep.subr.msk.bf16.mxu0 %vm6206_vm2, %v5458_v33 }
 0xedc   :  { %5463 = vmatpush3.bf16.xpose.msk.msra.mxu0 %vm6206_vm2, %v5458_v33 }
 0xee3   :  { %5093 = vmatmul.mubr.msk.f32.vlgmr.msra.gmra.mrb[26].mxu0 %vm394_vm1, %v2691_v35 }
 0xee4   :  { %5117 = vmatprep.mubr.msk.f32.mxu0 %vm77_vm0, %v6416_v49 }
 0xfb6   :  { %v5094_v6 = vpop.f32.mrb[26].mxu0 }
 0xfb7   :  { %v2964_v38 = vadd.f32 %v6481_v36, %v5094_v6  ;;  %v2958_v10 = vpop.f32.mrb[27].mxu0 }
 0xfb8   :  { %v2959_v45 = vadd.f32 %v6484_v41, %v2958_v10 }
 0xfb9   :  { %v2970_v43 = vsel %vm482_vm3, %v2964_v38, -inf }
 0xfba   :  { %2971 = vmax.xlane.f32.xlu0 %v2970_v43  ;;  %v2967_v37 = vsel %vm482_vm3, %v2959_v45, -inf }
 0xfbb   :  { %2968 = vmax.xlane.f32.xlu1 %v2967_v37 }
 0xfbe   :  { %2582 = vmax.xlane.f32.xlu0 %v2581_v47 }
 0xfc2   :  { %2585 = vmax.xlane.f32.xlu0 %v2584_v48 }
0x1047   :  { %v2972_v50 = vpop.xlane.xlu0 %2971 }
0x1048   :  { %v2974_v51 = vsub.f32 %v2964_v38, %v2972_v50  ;;  %v2969_v52 = vpop.xlane.xlu1 %2968 }
0x1049   :  { %v2973_v55 = vsub.f32 %v2959_v45, %v2969_v52 }
0x104a   :  { %v2977_v53 = vmul.f32 1.442695, %v2974_v51 }
0x104b   :  { %v2583_v12 = vpop.xlane.xlu0 %2582  ;;  %v2975_v56 = vmul.f32 1.442695, %v2973_v55 }
0x104c   :  { %5860 = vpow2.f32 %v2977_v53  ;;  %v2587_v13 = vsub.f32 %v2573_v42, %v2583_v12 }
0x104e   :  { %v2589_v57 = vmul.f32 1.442695, %v2587_v13 }
0x104f   :  { %v2586_v61 = vpop.xlane.xlu0 %2585 }
0x1050   :  { %5862 = vpow2.f32 %v2589_v57  ;;  %v2588_v62 = vsub.f32 %v2578_v44, %v2586_v61 }
0x1051   :  { %5864 = vpow2.f32 %v2975_v56 }
0x1052   :  { %v2591_v0 = vmul.f32 1.442695, %v2588_v62 }
0x1054   :  { %5866 = vpow2.f32 %v2591_v0 }
0x1056   :  { %v5861_v1 = vpop.eup %5860 }
0x1057   :  { %v2982_v2 = vsel %vm482_vm3, %v5861_v1, 0.0 }
0x1058   :  { %2983 = vadd.xlane.f32.xlu0 %v2982_v2 }
0x105a   :  { %v5863_v3 = vpop.eup %5862 }
0x105b   :  { %v2593_v30 = vsel %vm482_vm3, %v5863_v3, 0.0  ;;  %v5865_v4 = vpop.eup %5864 }
0x105c   :  { %2594 = vadd.xlane.f32.xlu1 %v2593_v30  ;;  %v2979_v14 = vsel %vm482_vm3, %v5865_v4, 0.0 }
0x105e   :  { %v6495_v5 = vpop.eup %5866 }
0x105f   :  { %v2596_v15 = vsel %vm482_vm3, %v6495_v5, 0.0 }
0x1060   :  { %2980 = vadd.xlane.f32.xlu1 %v2979_v14  ;;  %2597 = vadd.xlane.f32.xlu0 %v2596_v15 }
0x1071   :  { %2802 = vrot.lane.b32.xlu1 %v6441_v60, %s6022_s3 }
0x1075   :  { %5756 = vrot.lane.b32.xlu1 %v6377_v63, %s6025_s13 }
0x1076   :  { %5751 = vrot.lane.b32.xlu0 %v6373_v7, %s6025_s13 }
0x1079   :  { %5761 = vrot.lane.b32.xlu1 %v6373_v7, %s6026_s14 }
0x107a   :  { %3253 = vrot.lane.b32.xlu0 %v6385_v8, %s6026_s14 }
0x107d   :  { %5766 = vrot.lane.b32.xlu1 %v6377_v63, %s6026_s14 }
0x107e   :  { %5771 = vrot.lane.b32.xlu0 %v6391_v9, %s6027_s15 }
0x1081   :  { %3163 = vrot.lane.b32.xlu1 %v6397_v11, %s6026_s14 }
0x1085   :  { %5776 = vrot.lane.b32.xlu1 %v6401_v39, %s6027_s15 }
0x10e5   :  { %v2984_v40 = vpop.xlane.xlu0 %2983 }
0x10e6   :  { %5868 = vrcp.f32 %v2984_v40 }
0x10e9   :  { %v2595_v16 = vpop.xlane.xlu1 %2594 }
0x10ea   :  { %5870 = vrcp.f32 %v2595_v16 }
0x10ed   :  { %v2981_v17 = vpop.xlane.xlu1 %2980  ;;  %v2598_v54 = vpop.xlane.xlu0 %2597 }
0x10ee   :  { %5872 = vrcp.f32 %v2981_v17 }
0x10ef   :  { %5874 = vrcp.f32 %v2598_v54 }
0x10f0   :  { %v5869_v24 = vpop.eup %5868 }
0x10f1   :  { %v2803_v59 = vpop.permute.xlu1 %2802  ;;  %v5752_v18 = vpop.permute.xlu0 %5751 }
0x10f2   :  { %v2872_v19 = vadd.f32 %v6461_v23, %v2803_v59  ;;  %v2877_v34 = vadd.f32 %v6459_v46, %v2803_v59  ;;  %v5754_v26 = vunpack.i.h.bf16 %v5752_v18  ;;  %v5753_v27 = vunpack.i.l.bf16 %v5752_v18 }
0x10f3   :  { %v2988_v23 = vmul.f32 %v5869_v24, %v5861_v1 }
0x10f4   :  { %v5464_v20 = vpack.c.bf16 %v2877_v34, %v2872_v19  ;;  %v5871_v29 = vpop.eup %5870  ;;  %v5480_v38 = vpack.c.bf16 %v5754_v26, %v5753_v27 }
0x10f5   :  { %v5757_v21 = vpop.permute.xlu1 %5756  ;;  %v6520_v22 = vpop.permute.xlu0 %3253  ;;  %v2600_v10 = vmul.f32 %v5871_v29, %v5863_v3 }
0x10f6   :  { %5465 = vmatprep.subr.bf16.mxu1 %v5464_v20  ;;  %v5759_v44 = vunpack.i.h.bf16 %v5757_v21  ;;  %v5758_v47 = vunpack.i.l.bf16 %v5757_v21 }
0x10f7   :  { %5467 = vmatpush3.bf16.msra.mxu1 %v5464_v20 }
0x10f8   :  { %v5873_v31 = vpop.eup %5872  ;;  %5469 = vmatprep.subr.bf16.mxu1 %v6446_v58  ;;  %v5484_v13 = vpack.c.bf16 %v5759_v44, %v5758_v47 }
0x10f9   :  { %v5762_v32 = vpop.permute.xlu1 %5761  ;;  %v2986_v33 = vmul.f32 %v5873_v31, %v5865_v4  ;;  %v5772_v35 = vpop.permute.xlu0 %5771 }
0x10fa   :  { %v5764_v6 = vunpack.i.h.bf16 %v5762_v32  ;;  %v5763_v46 = vunpack.i.l.bf16 %v5762_v32  ;;  %v5774_v42 = vunpack.i.h.bf16 %v5772_v35  ;;  %v5773_v43 = vunpack.i.l.bf16 %v5772_v35  ;;  %v5875_v51 = vpop.eup %5874 }
0x10fb   :  { %5099 = vmatprep.mubr.msk.f32.mxu1 %vm482_vm3, %v2986_v33  ;;  %v2602_v12 = vmul.f32 %v5875_v51, %v6495_v5 }
0x10fc   :  { %v5472_v45 = vpack.c.bf16 %v5764_v6, %v5763_v46  ;;  %5100 = vmatmul.mubr.msk.f32.vlgmr.msra.gmra.mrb[28].mxu1 %vm482_vm3, %v2988_v23  ;;  %v5488_v53 = vpack.c.bf16 %v5774_v42, %v5773_v43 }
0x10fd   :  { %5471 = vmatpush3.bf16.msra.mxu1 %v6446_v58  ;;  %v5767_v37 = vpop.permute.xlu1 %5766  ;;  %5106 = vmatprep.mubr.msk.f32.mxu1 %vm482_vm3, %v2600_v10 }
0x10fe   :  { %v5769_v48 = vunpack.i.h.bf16 %v5767_v37  ;;  %v5768_v50 = vunpack.i.l.bf16 %v5767_v37  ;;  %5473 = vmatprep.subr.bf16.mxu0 %v5472_v45  ;;  %5481 = vmatprep.subr.bf16.mxu1 %v5480_v38 }
0x10ff   :  { %5475 = vmatpush3.bf16.msra.mxu0 %v5472_v45 }
0x1100   :  { %v5476_v52 = vpack.c.bf16 %v5769_v48, %v5768_v50 }
0x1101   :  { %v3164_v55 = vpop.permute.xlu1 %3163 }
0x1102   :  { %5477 = vmatprep.subr.bf16.mxu0 %v5476_v52 }
0x1103   :  { %5479 = vmatpush3.bf16.msra.mxu0 %v5476_v52 }
0x1104   :  { %5107 = vmatmul.mubr.msk.f32.vlgmr.msra.gmra.mrb[28].mxu1 %vm482_vm3, %v2602_v12  ;;  %5489 = vmatprep.subr.bf16.mxu0 %v5488_v53 }
0x1105   :  { %5483 = vmatpush3.bf16.msra.mxu1 %v5480_v38  ;;  %v5777_v58 = vpop.permute.xlu1 %5776  ;;  %5128 = vmatprep.mubr.msk.f32.mxu1 %vm77_vm0, %v6416_v49 }
0x1106   :  { %v5779_v56 = vunpack.i.h.bf16 %v5777_v58  ;;  %v5778_v57 = vunpack.i.l.bf16 %v5777_v58  ;;  %5118 = vmatmul.mubr.msk.f32.vlgmr.msra.gmra.mrb[28].mxu0 %vm77_vm0, %v6419_v28  ;;  %5485 = vmatprep.subr.bf16.mxu1 %v5484_v13 }
0x1107   :  { %5491 = vmatpush3.bf16.msra.mxu0 %v5488_v53  ;;  %5139 = vmatprep.mubr.msk.f32.mxu0 %vm77_vm0, %v6416_v49 }
0x1108   :  { %v5492_v61 = vpack.c.bf16 %v5779_v56, %v5778_v57 }
0x1109   :  { %5487 = vmatpush3.bf16.msra.mxu1 %v5484_v13 }
0x110a   :  { %5493 = vmatprep.subr.bf16.mxu0 %v5492_v61 }
0x110b   :  { %5495 = vmatpush3.bf16.msra.mxu0 %v5492_v61 }
0x110c   :  { %5129 = vmatmul.mubr.msk.f32.vlgmr.msra.gmra.mrb[30].mxu1 %vm77_vm0, %v6419_v28 }
0x110e   :  { %5140 = vmatmul.mubr.msk.f32.vlgmr.msra.gmra.mrb[30].mxu0 %vm77_vm0, %v6419_v28 }
0x110f   :  { %5164 = vmatprep.mubr.msk.f32.mxu0 %vm77_vm0, %v6416_v49 }
0x11d9   :  { %v5119_v62 = vpop.f32.mrb[28].mxu0 }
0x11da   :  { %v3232_v0 = vpop.f32.mrb[29].mxu0  ;;  %v3238_v40 = vadd.f32 %v5119_v62, %v3164_v55 }
0x11db   :  { %v3233_v1 = vadd.f32 %v3232_v0, %v3164_v55 }
0x11dd   :  { %5146 = vmatprep.mubr.msk.f32.mxu1 %vm394_vm1, %v3233_v1 }
0x11df   :  { %v5130_v2 = vpop.f32.mrb[30].mxu1 }
0x11e0   :  { %v3328_v3 = vadd.f32 %v5130_v2, %v6520_v22  ;;  %v3322_v30 = vpop.f32.mrb[31].mxu1 }
0x11e1   :  { %v3323_v4 = vadd.f32 %v3322_v30, %v6520_v22  ;;  %v5141_v5 = vpop.f32.mrb[30].mxu0 }
0x11e2   :  { %v3412_v14 = vpop.f32.mrb[31].mxu0 }
0x11e3   :  { %v5496_v15 = vpack.c.bf16 %v3328_v3, %v3323_v4 }
0x11e5   :  { %5498 = vmatprep.subr.msk.bf16.mxu1 %vm6206_vm2, %v5496_v15 }
0x11e6   :  { %5501 = vmatpush3.bf16.xpose.msk.msra.mxu1 %vm6206_vm2, %v5496_v15 }
0x11ed   :  { %5147 = vmatmul.mubr.msk.f32.vlgmr.msra.gmra.mrb[32].mxu1 %vm394_vm1, %v3238_v40 }
0x12c0   :  { %v5148_v16 = vpop.f32.mrb[32].mxu1 }
0x12c1   :  { %v3505_v17 = vadd.f32 %v6481_v36, %v5148_v16  ;;  %v3499_v54 = vpop.f32.mrb[33].mxu1 }
0x12c2   :  { %v3500_v59 = vadd.f32 %v6484_v41, %v3499_v54 }
0x12c3   :  { %v3511_v18 = vsel %vm482_vm3, %v3505_v17, -inf }
0x12c4   :  { %3512 = vmax.xlane.f32.xlu1 %v3511_v18  ;;  %v3508_v19 = vsel %vm482_vm3, %v3500_v59, -inf }
0x12c5   :  { %3509 = vmax.xlane.f32.xlu0 %v3508_v19 }
0x12d5   :  { %5781 = vrot.lane.b32.xlu1 %v6373_v7, %s6029_s17 }
0x12d9   :  { %5786 = vrot.lane.b32.xlu1 %v6377_v63, %s6029_s17 }
0x12dd   :  { %5791 = vrot.lane.b32.xlu1 %v6373_v7, %s6028_s16 }
0x12e1   :  { %3715 = vrot.lane.b32.xlu1 %v6385_v8, %s6028_s16 }
0x12e5   :  { %5801 = vrot.lane.b32.xlu1 %v6391_v9, %s6030_s19 }
0x1351   :  { %v3513_v34 = vpop.xlane.xlu1 %3512 }
0x1352   :  { %v3515_v20 = vsub.f32 %v3505_v17, %v3513_v34  ;;  %v3510_v21 = vpop.xlane.xlu0 %3509 }
0x1353   :  { %v3514_v22 = vsub.f32 %v3500_v59, %v3510_v21 }
0x1354   :  { %v3518_v24 = vmul.f32 1.442695, %v3515_v20 }
0x1355   :  { %v3516_v26 = vmul.f32 1.442695, %v3514_v22  ;;  %v5782_v8 = vpop.permute.xlu1 %5781 }
0x1356   :  { %5876 = vpow2.f32 %v3518_v24  ;;  %v5784_v45 = vunpack.i.h.bf16 %v5782_v8  ;;  %v5783_v42 = vunpack.i.l.bf16 %v5782_v8 }
0x1357   :  { %5878 = vpow2.f32 %v3516_v26 }
0x1358   :  { %v5514_v48 = vpack.c.bf16 %v5784_v45, %v5783_v42 }
0x1359   :  { %v5787_v33 = vpop.permute.xlu1 %5786 }
0x135a   :  { %v5788_v55 = vunpack.i.l.bf16 %v5787_v33 }
0x135d   :  { %v5792_v35 = vpop.permute.xlu1 %5791 }
0x135e   :  { %v5794_v9 = vunpack.i.h.bf16 %v5792_v35  ;;  %v5793_v23 = vunpack.i.l.bf16 %v5792_v35 }
0x1360   :  { %v5877_v27 = vpop.eup %5876  ;;  %v5506_v6 = vpack.c.bf16 %v5794_v9, %v5793_v23 }
0x1361   :  { %v3523_v29 = vsel %vm482_vm3, %v5877_v27, 0.0  ;;  %v5879_v31 = vpop.eup %5878  ;;  %v3716_v38 = vpop.permute.xlu1 %3715 }
0x1362   :  { %3524 = vadd.xlane.f32.xlu0 %v3523_v29  ;;  %v3520_v32 = vsel %vm482_vm3, %v5879_v31, 0.0  ;;  %5507 = vmatprep.subr.bf16.mxu0 %v5506_v6 }
0x1363   :  { %5509 = vmatpush3.bf16.msra.mxu0 %v5506_v6 }
0x1365   :  { %v5802_v37 = vpop.permute.xlu1 %5801 }
0x1366   :  { %3521 = vadd.xlane.f32.xlu0 %v3520_v32  ;;  %v5804_v51 = vunpack.i.h.bf16 %v5802_v37  ;;  %v5803_v52 = vunpack.i.l.bf16 %v5802_v37 }
0x1368   :  { %v5522_v57 = vpack.c.bf16 %v5804_v51, %v5803_v52 }
0x137c   :  { %3343 = vrot.lane.b32.xlu0 %v6441_v60, %s6027_s15 }
0x1380   :  { %5796 = vrot.lane.b32.xlu0 %v6377_v63, %s6028_s16 }
0x1384   :  { %3625 = vrot.lane.b32.xlu0 %v6397_v11, %s6028_s16  ;;  %v5789_v11 = vunpack.i.h.bf16 %v5787_v33 }
0x1386   :  { %v5518_v1 = vpack.c.bf16 %v5789_v11, %v5788_v55 }
0x1388   :  { %5806 = vrot.lane.b32.xlu0 %v6401_v39, %s6030_s19 }
0x13ef   :  { %v3525_v46 = vpop.xlane.xlu0 %3524 }
0x13f0   :  { %5880 = vrcp.f32 %v3525_v46 }
0x13f3   :  { %v3522_v10 = vpop.xlane.xlu0 %3521 }
0x13f4   :  { %5882 = vrcp.f32 %v3522_v10 }
0x13f7   :  { %v3344_v43 = vpop.permute.xlu0 %3343 }
0x13f8   :  { %v3413_v44 = vadd.f32 %v3412_v14, %v3344_v43  ;;  %v3418_v47 = vadd.f32 %v5141_v5, %v3344_v43 }
0x13fa   :  { %v5502_v50 = vpack.c.bf16 %v3418_v47, %v3413_v44  ;;  %v5881_v13 = vpop.eup %5880  ;;  %v4539_v44 = vld [vmem:[#allocation7 + $0xd] ss:$0 sm:$0xff] }
0x13fb   :  { %v5797_v53 = vpop.permute.xlu0 %5796  ;;  %v3529_v0 = vmul.f32 %v5881_v13, %v5877_v27 }
0x13fc   :  { %v5799_v12 = vunpack.i.h.bf16 %v5797_v53  ;;  %v5798_v39 = vunpack.i.l.bf16 %v5797_v53  ;;  %5503 = vmatprep.subr.bf16.mxu1 %v5502_v50 }
0x13fd   :  { %5505 = vmatpush3.bf16.msra.mxu1 %v5502_v50 }
0x13fe   :  { %v5883_v58 = vpop.eup %5882  ;;  %v5510_v56 = vpack.c.bf16 %v5799_v12, %v5798_v39  ;;  %5515 = vmatprep.subr.bf16.mxu1 %v5514_v48 }
0x13ff   :  { %v3626_v61 = vpop.permute.xlu0 %3625  ;;  %v3527_v62 = vmul.f32 %v5883_v58, %v5879_v31 }
0x1400   :  { %5511 = vmatprep.subr.bf16.mxu0 %v5510_v56 }
0x1401   :  { %5153 = vmatprep.mubr.msk.f32.mxu1 %vm482_vm3, %v3527_v62  ;;  %5513 = vmatpush3.bf16.msra.mxu0 %v5510_v56 }
0x1402   :  { %5154 = vmatmul.mubr.msk.f32.vlgmr.msra.gmra.mrb[28].mxu1 %vm482_vm3, %v3529_v0  ;;  %5523 = vmatprep.subr.bf16.mxu0 %v5522_v57 }
0x1403   :  { %5517 = vmatpush3.bf16.msra.mxu1 %v5514_v48  ;;  %5175 = vmatprep.mubr.msk.f32.mxu1 %vm77_vm0, %v6416_v49  ;;  %v5807_v2 = vpop.permute.xlu0 %5806 }
0x1404   :  { %v5809_v3 = vunpack.i.h.bf16 %v5807_v2  ;;  %v5808_v30 = vunpack.i.l.bf16 %v5807_v2  ;;  %5165 = vmatmul.mubr.msk.f32.vlgmr.msra.gmra.mrb[32].mxu0 %vm77_vm0, %v6419_v28  ;;  %5519 = vmatprep.subr.bf16.mxu1 %v5518_v1 }
0x1405   :  { %5525 = vmatpush3.bf16.msra.mxu0 %v5522_v57  ;;  %5186 = vmatprep.mubr.msk.f32.mxu0 %vm77_vm0, %v6416_v49 }
0x1406   :  { %v5526_v4 = vpack.c.bf16 %v5809_v3, %v5808_v30 }
0x1407   :  { %5521 = vmatpush3.bf16.msra.mxu1 %v5518_v1 }
0x1408   :  { %5527 = vmatprep.subr.bf16.mxu0 %v5526_v4 }
0x1409   :  { %5529 = vmatpush3.bf16.msra.mxu0 %v5526_v4 }
0x140a   :  { %5176 = vmatmul.mubr.msk.f32.vlgmr.msra.gmra.mrb[34].mxu1 %vm77_vm0, %v6419_v28 }
0x140c   :  { %5187 = vmatmul.mubr.msk.f32.vlgmr.msra.gmra.mrb[34].mxu0 %vm77_vm0, %v6419_v28 }
0x14d7   :  { %v5166_v5 = vpop.f32.mrb[32].mxu0 }
0x14d8   :  { %v3694_v14 = vpop.f32.mrb[33].mxu0  ;;  %v3700_v34 = vadd.f32 %v5166_v5, %v3626_v61 }
0x14d9   :  { %v3695_v15 = vadd.f32 %v3694_v14, %v3626_v61 }
0x14db   :  { %5193 = vmatprep.mubr.msk.f32.mxu1 %vm394_vm1, %v3695_v15 }
0x14dd   :  { %v5177_v40 = vpop.f32.mrb[34].mxu1 }
0x14de   :  { %v3790_v16 = vadd.f32 %v5177_v40, %v3716_v38  ;;  %v3784_v17 = vpop.f32.mrb[35].mxu1 }
0x14df   :  { %v3785_v54 = vadd.f32 %v3784_v17, %v3716_v38  ;;  %v5188_v59 = vpop.f32.mrb[34].mxu0  ;;  %v4122_v17 = vld [vmem:[#allocation8 + $0xc8] sm:$0xff] }
0x14e0   :  { %v3874_v18 = vpop.f32.mrb[35].mxu0 }
0x14e1   :  { %v5530_v19 = vpack.c.bf16 %v3790_v16, %v3785_v54  ;;  %v4121_v16 = vld [vmem:[#allocation8 + $0xc0] sm:$0xff] }
0x14e3   :  { %5532 = vmatprep.subr.msk.bf16.mxu1 %vm6206_vm2, %v5530_v19 }
0x14e4   :  { %5535 = vmatpush3.bf16.xpose.msk.msra.mxu1 %vm6206_vm2, %v5530_v19 }
0x14eb   :  { %5194 = vmatmul.mubr.msk.f32.vlgmr.msra.gmra.mrb[36].mxu1 %vm394_vm1, %v3700_v34 }
0x15be   :  { %v5195_v20 = vpop.f32.mrb[36].mxu1 }
0x15bf   :  { %v3967_v21 = vadd.f32 %v6481_v36, %v5195_v20  ;;  %v3961_v22 = vpop.f32.mrb[37].mxu1  ;;  %v4540_v20 = vld [vmem:[#allocation7 + $0xe] ss:$0 sm:$0xff] }
0x15c0   :  { %v3962_v24 = vadd.f32 %v6484_v41, %v3961_v22 }
0x15c1   :  { %v3973_v26 = vsel %vm482_vm3, %v3967_v21, -inf }
0x15c2   :  { %3974 = vmax.xlane.f32.xlu0 %v3973_v26  ;;  %v3970_v27 = vsel %vm482_vm3, %v3962_v24, -inf  ;;  %v4541_v26 = vld [vmem:[#allocation7 + $0xf] ss:$0 sm:$0xff] }
0x15c3   :  { %3971 = vmax.xlane.f32.xlu1 %v3970_v27 }
0x15d4   :  { %3805 = vrot.lane.b32.xlu1 %v6441_v60, %s6030_s19 }
0x15d8   :  { %5811 = vrot.lane.b32.xlu1 %v6373_v7, %s6027_s15 }
0x164f   :  { %v3975_v25 = vpop.xlane.xlu0 %3974 }
0x1650   :  { %v3977_v29 = vsub.f32 %v3967_v21, %v3975_v25  ;;  %v3972_v31 = vpop.xlane.xlu1 %3971  ;;  %v4123_v25 = vld [vmem:[#allocation8 + $0xd0] sm:$0xff] }
0x1651   :  { %v3976_v32 = vsub.f32 %v3962_v24, %v3972_v31 }
0x1652   :  { %v3980_v8 = vmul.f32 1.442695, %v3977_v29  ;;  %v4124_v29 = vld [vmem:[#allocation8 + $0xd8] sm:$0xff] }
0x1653   :  { %v3978_v33 = vmul.f32 1.442695, %v3976_v32 }
0x1654   :  { %v3806_v35 = vpop.permute.xlu1 %3805 }
0x1655   :  { %5884 = vpow2.f32 %v3978_v33  ;;  %v3875_v36 = vadd.f32 %v3874_v18, %v3806_v35  ;;  %v3880_v9 = vadd.f32 %v5188_v59, %v3806_v35  ;;  %v5548_v18 = vpack.c.bf16 %v4122_v17, %v4121_v16  ;;  %v4125_v33 = vld [vmem:[#allocation8 + $0xe0] sm:$0xff]  ;;  %v4126_v35 = vld [vmem:[#allocation8 + $0xe8] sm:$0xff] }
0x1656   :  { %5886 = vpow2.f32 %v3980_v8  ;;  %v5552_v8 = vpack.c.bf16 %v4124_v29, %v4123_v25 }
0x1657   :  { %v5536_v41 = vpack.c.bf16 %v3880_v9, %v3875_v36  ;;  %v5556_v36 = vpack.c.bf16 %v4126_v35, %v4125_v33  ;;  %v4127_v9 = vld [vmem:[#allocation8 + $0xf0] sm:$0xff] }
0x1658   :  { %v5812_v7 = vpop.permute.xlu1 %5811 }
0x1659   :  { %5537 = vmatprep.subr.bf16.mxu1 %v5536_v41  ;;  %v5814_v0 = vunpack.i.h.bf16 %v5812_v7  ;;  %v5813_v1 = vunpack.i.l.bf16 %v5812_v7 }
0x165a   :  { %5539 = vmatpush3.bf16.msra.mxu1 %v5536_v41  ;;  %v4128_v41 = vld [vmem:[#allocation8 + $0xf8] sm:$0xff] }
0x165b   :  { %v5540_v2 = vpack.c.bf16 %v5814_v0, %v5813_v1 }
0x165d   :  { %5541 = vmatprep.subr.bf16.mxu0 %v5540_v2 }
0x165e   :  { %5543 = vmatpush3.bf16.msra.mxu0 %v5540_v2 }
0x165f   :  { %v5885_v23 = vpop.eup %5884 }
0x1660   :  { %v3982_v6 = vsel %vm482_vm3, %v5885_v23, 0.0  ;;  %v5887_v46 = vpop.eup %5886 }
0x1661   :  { %3983 = vadd.xlane.f32.xlu0 %v3982_v6  ;;  %v3985_v60 = vsel %vm482_vm3, %v5887_v46, 0.0  ;;  %v4315_v6 = vld [vmem:[#allocation7 + $0x18] sm:$0xff] }
0x1665   :  { %3986 = vadd.xlane.f32.xlu0 %v3985_v60 }
0x16ee   :  { %v3984_v38 = vpop.xlane.xlu0 %3983 }
0x16ef   :  { %5888 = vrcp.f32 %v3984_v38  ;;  %v4542_v38 = vld [vmem:[#allocation7 + $0x10] ss:$0 sm:$0xff] }
0x16f2   :  { %v3987_v10 = vpop.xlane.xlu0 %3986 }
0x16f3   :  { %5890 = vrcp.f32 %v3987_v10 }
0x16f9   :  { %v5889_v45 = vpop.eup %5888 }
0x16fa   :  { %v3989_v42 = vmul.f32 %v5889_v45, %v5885_v23  ;;  %v5560_v23 = vpack.c.bf16 %v4128_v41, %v4127_v9 }
0x16fc   :  { %5200 = vmatprep.mubr.msk.f32.mxu1 %vm482_vm3, %v3989_v42 }
0x16fd   :  { %v5891_v43 = vpop.eup %5890 }
0x16fe   :  { %v3991_v37 = vmul.f32 %v5891_v43, %v5887_v46  ;;  %v4316_v46 = vld [vmem:[#allocation7 + $0x20] sm:$0xff] }
0x16ff   :  { %v5564_v60 = vpack.c.bf16 %v4316_v46, %v4315_v6 }
0x1700   :  { %5201 = vmatmul.mubr.msk.f32.vlgmr.msra.gmra.mrb[28].mxu1 %vm482_vm3, %v3991_v37 }
0x1701   :  { %5565 = vmatprep.subr.bf16.mxu1 %v5564_v60 }
0x1702   :  { %5567 = vmatpush3.bf16.msra.mxu1 %v5564_v60 }
0x17d3   :  { %v5202_v47 = vpop.f32.mrb[28].mxu1 }
0x17d4   :  { %v4064_v48 = vpop.f32.mrb[29].mxu1  ;;  %v4080_v50 = vadd.f32 %v5202_v47, %v4539_v44  ;;  %v4317_v47 = vld [vmem:[#allocation7 + $0x28] sm:$0xff] }
0x17d5   :  { %v4079_v51 = vadd.f32 %v4539_v44, %v4064_v48  ;;  %v4318_v48 = vld [vmem:[#allocation7 + $0x30] sm:$0xff] }
0x17d6   :  { %v6605_v53 = vadd.f32 %v4080_v50, %v6419_v28  ;;  %v5568_v50 = vpack.c.bf16 %v4318_v48, %v4317_v47 }
0x17d7   :  { %v6602_v52 = vadd.f32 %v4079_v51, %v6416_v49  ;;  %v4545_v51 = vld [vmem:[#allocation7 + $0x11] ss:$0 sm:$0xff] }
0x17d8   :  { %v4086_v55 = vsel %vm77_vm0, %v6605_v53, 0.0  ;;  %5569 = vmatprep.subr.bf16.mxu1 %v5568_v50 }
0x17d9   :  { %v4083_v11 = vsel %vm77_vm0, %v6602_v52, 0.0  ;;  %5571 = vmatpush3.bf16.msra.mxu1 %v5568_v50 }
0x17da   :  { %4084 = vadd.xlane.f32.xlu0 %v4083_v11 }
0x17de   :  { %4087 = vadd.xlane.f32.xlu0 %v4086_v55 }
0x1867   :  { %v4085_v12 = vpop.xlane.xlu0 %4084 }
0x1868   :  { %v4089_v39 = vmul.f32 0.03125, %v4085_v12 }
0x186a   :  { %v4091_v49 = vsub.f32 %v6602_v52, %v4089_v39 }
0x186b   :  { %v4088_v13 = vpop.xlane.xlu0 %4087 }
0x186c   :  { %v4090_v58 = vmul.f32 0.03125, %v4088_v13  ;;  %v4093_v61 = vmul.f32 %v4091_v49, %v4091_v49 }
0x186e   :  { %v4092_v28 = vsub.f32 %v6605_v53, %v4090_v58  ;;  %v4095_v62 = vsel %vm77_vm0, %v4093_v61, 0.0 }
0x1870   :  { %v4094_v56 = vmul.f32 %v4092_v28, %v4092_v28 }
0x1872   :  { %v4098_v57 = vsel %vm77_vm0, %v4094_v56, 0.0 }
0x1873   :  { %4099 = vadd.xlane.f32.xlu0 %v4098_v57 }
0x1877   :  { %4096 = vadd.xlane.f32.xlu0 %v4095_v62 }
0x188d   :  { %5816 = vrot.lane.b32.xlu0 %v6377_v63, %s6027_s15 }
0x1900   :  { %v4100_v3 = vpop.xlane.xlu0 %4099 }
0x1901   :  { %v4102_v30 = vmul.f32 0.03125, %v4100_v3 }
0x1903   :  { %v4104_v4 = vadd.f32 1e-06, %v4102_v30 }
0x1904   :  { %v4097_v5 = vpop.xlane.xlu0 %4096 }
0x1905   :  { %5892 = vrsqrt.f32 %v4104_v4  ;;  %v4101_v14 = vmul.f32 0.03125, %v4097_v5 }
0x1907   :  { %v4103_v15 = vadd.f32 1e-06, %v4101_v14 }
0x1908   :  { %v5817_v40 = vpop.permute.xlu0 %5816 }
0x1909   :  { %5894 = vrsqrt.f32 %v4103_v15  ;;  %v5819_v54 = vunpack.i.h.bf16 %v5817_v40  ;;  %v5818_v59 = vunpack.i.l.bf16 %v5817_v40 }
0x190b   :  { %v5544_v63 = vpack.c.bf16 %v5819_v54, %v5818_v59 }
0x190d   :  { %5545 = vmatprep.subr.bf16.mxu0 %v5544_v63 }
0x190e   :  { %5547 = vmatpush3.bf16.msra.mxu0 %v5544_v63 }
0x190f   :  { %v5893_v19 = vpop.eup %5892  ;;  %5549 = vmatprep.subr.bf16.mxu0 %v5548_v18 }
0x1910   :  { %v4108_v34 = vmul.f32 %v5893_v19, %v4092_v28 }
0x1912   :  { %v4114_v24 = vmul.f32 %v4540_v20, %v4108_v34 }
0x1913   :  { %v5895_v21 = vpop.eup %5894 }
0x1914   :  { %v4107_v22 = vmul.f32 %v5895_v21, %v4091_v49  ;;  %v4120_v32 = vadd.f32 %v4541_v26, %v4114_v24  ;;  %v4548_v49 = vld [vmem:[#allocation7 + $0x12] ss:$0 sm:$0xff] }
0x1916   :  { %v4113_v27 = vmul.f32 %v4540_v20, %v4107_v22 }
0x1918   :  { %v4119_v31 = vadd.f32 %v4541_v26, %v4113_v27 }
0x191a   :  { %5211 = vmatprep.mubr.msk.f32.mxu0 %vm77_vm0, %v4119_v31 }
0x191b   :  { %5212 = vmatmul.mubr.msk.f32.vlgmr.msra.gmra.mrb[36].mxu0 %vm77_vm0, %v4120_v32 }
0x191c   :  { %5551 = vmatpush3.bf16.msra.mxu0 %v5548_v18 }
0x191d   :  { %5553 = vmatprep.subr.bf16.mxu0 %v5552_v8 }
0x1920   :  { %5555 = vmatpush3.bf16.msra.mxu0 %v5552_v8 }
0x1921   :  { %5557 = vmatprep.subr.bf16.mxu0 %v5556_v36 }
0x1924   :  { %5559 = vmatpush3.bf16.msra.mxu0 %v5556_v36 }
0x1925   :  { %5561 = vmatprep.subr.bf16.mxu0 %v5560_v23 }
0x1928   :  { %5563 = vmatpush3.bf16.msra.mxu0 %v5560_v23 }
0x19ee   :  { %v5213_v10 = vpop.f32.mrb[36].mxu0 }
0x19ef   :  { %v4223_v45 = vadd.f32 %v5213_v10, %v4542_v38  ;;  %v4217_v42 = vpop.f32.mrb[37].mxu0 }
0x19f0   :  { %v4218_v43 = vadd.f32 %v4542_v38, %v4217_v42 }
0x19f1   :  { %v4227_v44 = vmax.f32 %v4223_v45, 0.0 }
0x19f2   :  { %v4226_v37 = vmax.f32 %v4218_v43, 0.0 }
0x19f4   :  { %5230 = vmatprep.mubr.msk.f32.mxu0 %vm2134_vm4, %v4226_v37 }
0x19f5   :  { %5231 = vmatmul.mubr.msk.f32.vlgmr.msra.gmra.mrb[38].mxu0 %vm2134_vm4, %v4227_v44 }
0x1ac8   :  { %v5232_v11 = vpop.f32.mrb[38].mxu0 }
0x1ac9   :  { %v4310_v55 = vadd.f32 %v5232_v11, %v4545_v51  ;;  %v4304_v12 = vpop.f32.mrb[39].mxu0 }
0x1aca   :  { %v4305_v39 = vadd.f32 %v4545_v51, %v4304_v12 }
0x1acb   :  { %v4314_v58 = vadd.f32 %v4310_v55, %v6605_v53 }
0x1acc   :  { %v4313_v13 = vadd.f32 %v4305_v39, %v6602_v52 }
0x1ace   :  { %5241 = vmatprep.mubr.msk.f32.mxu1 %vm77_vm0, %v4313_v13 }
0x1acf   :  { %5242 = vmatmul.mubr.msk.f32.vlgmr.msra.gmra.mrb[38].mxu1 %vm77_vm0, %v4314_v58 }
0x1ba2   :  { %v5243_v28 = vpop.f32.mrb[38].mxu1 }
0x1ba3   :  { %v4402_v56 = vadd.f32 %v5243_v28, %v4548_v49  ;;  %v4396_v57 = vpop.f32.mrb[39].mxu1 }
0x1ba4   :  { %v4397_v61 = vadd.f32 %v4548_v49, %v4396_v57 }
0x1ba5   :  { %4406 = vst [vmem:[#allocation10 + $0x8] sm:$0xff] %v4402_v56 }
0x1ba6   :  { %4405 = vst [vmem:[#allocation10] sm:$0xff] %v4397_v61 }
0x1ba7   :  { %5997 = shalt.err (!%p5994_p8)
}
0x1ba8   :  { %s5998_s25 = scalar_lea.hbm %s6646_s4, 256 }
0x1ba9   :  { %p5999_p9 = scmp.ne.s32.totalorder %s6646_s4, %s5998_s25  ;;  %p6002_p10 = scmp.lt.u32.totalorder %s5998_s25, %s6646_s4 }
0x1bab   :  { %p6004_p11 = pnand %p6002_p10, %p5999_p9 }
0x1bad   :  { %6007 = shalt.err (!%p6004_p11)
}
0x1bae   :  { %4418 = dma.vmem_to_hbm [thread:$0]  %s4413_s21, 256, %s6646_s4, [#allocation4], %s6018_s27, %s6018_s27, %s6019_s28  }
0x1baf   :  { %6014 = dma.done.wait [#allocation4], 256  }
0x1bb0   :  { %6015 = vsyncadd [#allocation4], 4294967040 }
0x1bb1   :  { %4422 = vsyncpa [#allocation3], 1 }
0x1bb2   :  { %4423 = vsyncpa [#allocation6], 1 }
0x1bb3   :  { %4424 = vsyncpa [#allocation9], 1 }
0x1bb4   :  { %4425 = vsyncpa [#allocation4], 1 }

</bundles_post_ra>
